<compile_context>
chip_gen: v5e
topology: v5e:2x2
jax: 0.10.0
libtpu: 0.0.40
codegen_flags: <defaults>
</compile_context>

<pallas_src>
import math

import jax
import jax.numpy as jnp
from jax.experimental import pallas as pl
from jax.experimental.pallas import tpu as pltpu

# ----------------------------- configuration --------------------------------
BATCH = 2
SEQ = 8
HIDDEN = 32
NUM_HEADS = 2
HEAD_DIM = HIDDEN // NUM_HEADS
INTERMEDIATE = 64
NUM_LABELS = 3
VOCAB = 50
TYPE_VOCAB = 2
NUM_LAYERS = 2
LN_EPS = 1e-12

OUT_ROWS = 8          # lane-dense packed output slab: (BATCH, 8, 128)
OUT_LANES = 128


# ------------------------------ kernel helpers -------------------------------
def _layer_norm(x, gamma, beta):
    # Two INDEPENDENT cross-lane reductions (sum, sum of squares); biased var,
    # matching torch.nn.LayerNorm.  x: (S, H); gamma/beta: (1, H).
    n = x.shape[-1]
    s1 = jnp.sum(x, axis=-1, keepdims=True)
    s2 = jnp.sum(x * x, axis=-1, keepdims=True)
    mean = s1 * (1.0 / n)
    var = s2 * (1.0 / n) - mean * mean
    inv = jax.lax.rsqrt(var + LN_EPS)
    return (x - mean) * inv * gamma + beta


# ------------------------------ fused Pallas kernel ---------------------------
def fused_forward_kernel(
    emb_ref,                     # (1, S, H)     summed embeddings (pre-LN), this example
    mask_ref,                    # (1, 1, S)     1.0 = attend, 0.0 = masked
    emb_g_ref, emb_b_ref,        # (1, H)        embedding LayerNorm
    wqkv_ref, bqkv_ref,          # (L, H, 3H), (L, 1, 3H)   fused QKV
    wo_ref, bo_ref,              # (L, H, H),  (L, 1, H)
    ln1g_ref, ln1b_ref,          # (L, 1, H)
    w1_ref, b1_ref,              # (L, H, I),  (L, 1, I)
    w2_ref, b2_ref,              # (L, I, H),  (L, 1, H)
    ln2g_ref, ln2b_ref,          # (L, 1, H)
    wd_ref, bd_ref,              # (H, H), (1, H)           classifier dense
    wcls_ref, bcls_ref,          # (H, NL), (1, NL)         classifier out_proj
    onehot_ref,                  # (1, 1, NL)
    out_ref,                     # (1, 8, 128)   packed: row0=logits, row1[0]=nll
):
    f32 = jnp.float32
    scale = 1.0 / math.sqrt(HEAD_DIM)

    # --- embedding LayerNorm; activations stay resident as (S, H) ---
    x = _layer_norm(emb_ref[0], emb_g_ref[...], emb_b_ref[...])          # (S, H)

    # additive attention bias, pre-broadcast ONCE to (NH, S, S) (hoisted)
    bias_row = (1.0 - mask_ref[0]) * (-1e9)                               # (1, S)
    attn_bias = jnp.broadcast_to(bias_row[None, :, :],
                                 (NUM_HEADS, SEQ, SEQ))                   # (NH,S,S)

    # --- encoder layers (static Python loop; NUM_LAYERS is tiny) ---
    for l in range(NUM_LAYERS):
        # fused QKV projection: one wide 2-D MXU matmul
        qkv = jnp.dot(x, wqkv_ref[l],
                      preferred_element_type=f32) + bqkv_ref[l]           # (S, 3H)

        # split Q/K/V once (32-lane-aligned slices), head-major reshape
        q = qkv[:, 0:HIDDEN].reshape(SEQ, NUM_HEADS, HEAD_DIM)            # (S,NH,D)
        k = qkv[:, HIDDEN:2 * HIDDEN].reshape(SEQ, NUM_HEADS, HEAD_DIM)
        v = qkv[:, 2 * HIDDEN:3 * HIDDEN].reshape(SEQ, NUM_HEADS, HEAD_DIM)

        # all heads at once: batched einsums, no per-head lane slicing
        s = jnp.einsum("qhd,khd->hqk", q, k,
                       preferred_element_type=f32) * scale                # (NH,S,S)
        s = s + attn_bias
        s_max = jnp.max(s, axis=-1, keepdims=True)
        p = jnp.exp(s - s_max)
        p = p / jnp.sum(p, axis=-1, keepdims=True)                        # exact softmax
        ctx = jnp.einsum("hqk,khd->qhd", p, v,
                         preferred_element_type=f32)                      # (S,NH,D)

        # single output projection on the full head-major context
        attn = jnp.dot(ctx.reshape(SEQ, HIDDEN), wo_ref[l],
                       preferred_element_type=f32) + bo_ref[l]            # (S, H)

        h1 = _layer_norm(x + attn, ln1g_ref[l], ln1b_ref[l])

        # FFN
        ff = jnp.dot(h1, w1_ref[l], preferred_element_type=f32) + b1_ref[l]
        ff = jax.nn.gelu(ff, approximate=True)   # TODO(synk): HF default is erf GELU
        ff = jnp.dot(ff, w2_ref[l], preferred_element_type=f32) + b2_ref[l]

        x = _layer_norm(h1 + ff, ln2g_ref[l], ln2b_ref[l])

    # --- ClassificationHead on the [CLS] token (dropout = identity, eval) ---
    cls = x[0:1, :]                                                       # (1, H)
    hcls = jnp.tanh(jnp.dot(cls, wd_ref[...],
                            preferred_element_type=f32) + bd_ref[...])
    logits = jnp.dot(hcls, wcls_ref[...],
                     preferred_element_type=f32) + bcls_ref[...]          # (1, NL)

    # --- per-example CrossEntropy NLL (batch mean taken in the wrapper) ---
    m = jnp.max(logits, axis=-1, keepdims=True)
    lse = m + jnp.log(jnp.sum(jnp.exp(logits - m), axis=-1, keepdims=True))
    picked = jnp.sum(onehot_ref[0] * logits, axis=-1, keepdims=True)      # (1, 1)
    nll = lse - picked                                                    # (1, 1)

    # --- pack logits + nll into a single lane-dense (8, 128) output slab ---
    logits_row = jnp.concatenate(
        [logits, jnp.zeros((1, OUT_LANES - NUM_LABELS), f32)], axis=-1)   # (1,128)
    nll_row = jnp.concatenate(
        [nll, jnp.zeros((1, OUT_LANES - 1), f32)], axis=-1)               # (1,128)
    slab = jnp.concatenate(
        [logits_row, nll_row, jnp.zeros((OUT_ROWS - 2, OUT_LANES), f32)],
        axis=0)                                                           # (8,128)
    out_ref[...] = slab[None, :, :]


# ------------------------------ pallas_call glue ------------------------------
def _fused_call(emb, mask3, emb_g, emb_b, wqkv, bqkv, wo, bo,
                ln1g, ln1b, w1, b1, w2, b2, ln2g, ln2b,
                wd, bd, wcls, bcls, onehot3):
    vmem_full = pl.BlockSpec(memory_space=pltpu.MemorySpace.VMEM)   # whole array in VMEM
    in_specs = [
        pl.BlockSpec((1, SEQ, HIDDEN), lambda b: (b, 0, 0)),        # emb (per example)
        pl.BlockSpec((1, 1, SEQ), lambda b: (b, 0, 0)),             # mask (per example)
        vmem_full, vmem_full,                                       # emb LN
        vmem_full, vmem_full,                                       # wqkv, bqkv
        vmem_full, vmem_full,                                       # wo, bo
        vmem_full, vmem_full,                                       # ln1
        vmem_full, vmem_full,                                       # w1, b1
        vmem_full, vmem_full,                                       # w2, b2
        vmem_full, vmem_full,                                       # ln2
        vmem_full, vmem_full,                                       # cls dense
        vmem_full, vmem_full,                                       # cls out_proj
        pl.BlockSpec((1, 1, NUM_LABELS), lambda b: (b, 0, 0)),      # onehot (per example)
    ]
    out_spec = pl.BlockSpec((1, OUT_ROWS, OUT_LANES), lambda b: (b, 0, 0))

    return pl.pallas_call(
        fused_forward_kernel,
        grid=(BATCH,),
        in_specs=in_specs,
        out_specs=out_spec,
        out_shape=jax.ShapeDtypeStruct((BATCH, OUT_ROWS, OUT_LANES), jnp.float32),
        compiler_params=pltpu.CompilerParams(
            dimension_semantics=("parallel",)),      # batch axis -> 2 TCs on v7x
    )(emb, mask3, emb_g, emb_b, wqkv, bqkv, wo, bo,
      ln1g, ln1b, w1, b1, w2, b2, ln2g, ln2b,
      wd, bd, wcls, bcls, onehot3)


# ------------------------------ parameters -----------------------------------
def init_params(key):
    keys = iter(jax.random.split(key, 64))

    def nrm(shape):
        return jax.random.normal(next(keys), shape, jnp.float32) * 0.02

    ones_h = jnp.ones((1, HIDDEN), jnp.float32)
    zeros_h = jnp.zeros((1, HIDDEN), jnp.float32)

    def stack(make):
        return jnp.stack([make() for _ in range(NUM_LAYERS)], axis=0)

    return {
        "word_emb": nrm((VOCAB, HIDDEN)),
        "pos_emb": nrm((SEQ, HIDDEN)),
        "type_emb": nrm((TYPE_VOCAB, HIDDEN)),
        "emb_ln_g": ones_h,
        "emb_ln_b": zeros_h,
        # stacked per-layer weights, fused QKV along the output dim
        "wqkv": stack(lambda: nrm((HIDDEN, 3 * HIDDEN))),
        "bqkv": jnp.zeros((NUM_LAYERS, 1, 3 * HIDDEN), jnp.float32),
        "wo": stack(lambda: nrm((HIDDEN, HIDDEN))),
        "bo": jnp.zeros((NUM_LAYERS, 1, HIDDEN), jnp.float32),
        "ln1_g": jnp.ones((NUM_LAYERS, 1, HIDDEN), jnp.float32),
        "ln1_b": jnp.zeros((NUM_LAYERS, 1, HIDDEN), jnp.float32),
        "w1": stack(lambda: nrm((HIDDEN, INTERMEDIATE))),
        "b1": jnp.zeros((NUM_LAYERS, 1, INTERMEDIATE), jnp.float32),
        "w2": stack(lambda: nrm((INTERMEDIATE, HIDDEN))),
        "b2": jnp.zeros((NUM_LAYERS, 1, HIDDEN), jnp.float32),
        "ln2_g": jnp.ones((NUM_LAYERS, 1, HIDDEN), jnp.float32),
        "ln2_b": jnp.zeros((NUM_LAYERS, 1, HIDDEN), jnp.float32),
        # classification head
        "cls_wd": nrm((HIDDEN, HIDDEN)),
        "cls_bd": zeros_h,
        "cls_wo": nrm((HIDDEN, NUM_LABELS)),
        "cls_bo": jnp.zeros((1, NUM_LABELS), jnp.float32),
    }


# ------------------------------ forward pass ----------------------------------
def asap_encoder_forward(params, input_ids, attention_mask, token_type_ids,
                         label_id=None):
    # Embedding gathers (glue); everything downstream runs inside one kernel.
    # TODO(synk): could be folded in-kernel via PrefetchScalarGridSpec + pl.Element
    # row-gather BlockSpecs on the embedding tables.
    pos_ids = jnp.arange(SEQ)
    emb = (
        params["word_emb"][input_ids]
        + params["pos_emb"][pos_ids][None, :, :]
        + params["type_emb"][token_type_ids]
    ).astype(jnp.float32)                                   # (B, S, H)

    mask3 = attention_mask.astype(jnp.float32)[:, None, :]  # (B, 1, S)

    if label_id is not None:
        onehot = jax.nn.one_hot(label_id, NUM_LABELS, dtype=jnp.float32)
    else:
        onehot = jnp.zeros((BATCH, NUM_LABELS), jnp.float32)
    onehot3 = onehot[:, None, :]                             # (B, 1, NL)

    packed = _fused_call(
        emb, mask3,
        params["emb_ln_g"], params["emb_ln_b"],
        params["wqkv"], params["bqkv"],
        params["wo"], params["bo"],
        params["ln1_g"], params["ln1_b"],
        params["w1"], params["b1"],
        params["w2"], params["b2"],
        params["ln2_g"], params["ln2_b"],
        params["cls_wd"], params["cls_bd"],
        params["cls_wo"], params["cls_bo"],
        onehot3,
    )                                                        # (B, 8, 128)

    logits = packed[:, 0, :NUM_LABELS]                       # (B, NL)
    if label_id is None:
        return logits, None
    loss = jnp.mean(packed[:, 1, 0])                         # mean CrossEntropy
    return logits, loss


# ---------------------------------- main ---------------------------------------
if __name__ == "__main__":
    key = jax.random.PRNGKey(0)
    k_param, k_ids, k_lbl = jax.random.split(key, 3)

    params = init_params(k_param)

    input_ids = jax.random.randint(k_ids, (BATCH, SEQ), 0, VOCAB, dtype=jnp.int32)
    attention_mask = jnp.ones((BATCH, SEQ), jnp.int32)
    attention_mask = attention_mask.at[1, SEQ - 2:].set(0)   # mask tail of example 1
    token_type_ids = jnp.zeros((BATCH, SEQ), jnp.int32)
    label_id = jax.random.randint(k_lbl, (BATCH,), 0, NUM_LABELS, dtype=jnp.int32)

    logits, loss = asap_encoder_forward(
        params, input_ids, attention_mask, token_type_ids, label_id
    )
    jax.block_until_ready(logits)
    jax.block_until_ready(loss)

    assert logits.shape == (BATCH, NUM_LABELS)
    assert loss.shape == ()
    assert bool(jnp.all(jnp.isfinite(logits))) and bool(jnp.isfinite(loss))
    print("KERNEL_OK")
</pallas_src>

<mosaic_0001>
module attributes {stable_mosaic.version = 11 : i64} {
  func.func @fused_forward_kernel(%arg0: i32, %arg1: memref<1x8x32xf32, #tpu.memory_space<vmem>>, %arg2: memref<1x1x8xf32, #tpu.memory_space<vmem>>, %arg3: memref<1x32xf32, #tpu.memory_space<vmem>>, %arg4: memref<1x32xf32, #tpu.memory_space<vmem>>, %arg5: memref<2x32x96xf32, #tpu.memory_space<vmem>>, %arg6: memref<2x1x96xf32, #tpu.memory_space<vmem>>, %arg7: memref<2x32x32xf32, #tpu.memory_space<vmem>>, %arg8: memref<2x1x32xf32, #tpu.memory_space<vmem>>, %arg9: memref<2x1x32xf32, #tpu.memory_space<vmem>>, %arg10: memref<2x1x32xf32, #tpu.memory_space<vmem>>, %arg11: memref<2x32x64xf32, #tpu.memory_space<vmem>>, %arg12: memref<2x1x64xf32, #tpu.memory_space<vmem>>, %arg13: memref<2x64x32xf32, #tpu.memory_space<vmem>>, %arg14: memref<2x1x32xf32, #tpu.memory_space<vmem>>, %arg15: memref<2x1x32xf32, #tpu.memory_space<vmem>>, %arg16: memref<2x1x32xf32, #tpu.memory_space<vmem>>, %arg17: memref<32x32xf32, #tpu.memory_space<vmem>>, %arg18: memref<1x32xf32, #tpu.memory_space<vmem>>, %arg19: memref<32x3xf32, #tpu.memory_space<vmem>>, %arg20: memref<1x3xf32, #tpu.memory_space<vmem>>, %arg21: memref<1x1x3xf32, #tpu.memory_space<vmem>>, %arg22: memref<1x8x128xf32, #tpu.memory_space<vmem>>) attributes {dimension_semantics = [#tpu.dimension_semantics<parallel>], iteration_bounds = array<i64: 2>, scalar_prefetch = 0 : i64, scratch_operands = 0 : i64, tpu.core_type = #tpu.core_type<tc>, window_params = [{transform_indices = @transform_0, window_bounds = array<i64: 1, 8, 32>}, {transform_indices = @transform_1, window_bounds = array<i64: 1, 1, 8>}, {pipeline_mode = #tpu.pipeline_mode<synchronous>, transform_indices = @transform_2, window_bounds = array<i64: 1, 32>}, {pipeline_mode = #tpu.pipeline_mode<synchronous>, transform_indices = @transform_3, window_bounds = array<i64: 1, 32>}, {pipeline_mode = #tpu.pipeline_mode<synchronous>, transform_indices = @transform_4, window_bounds = array<i64: 2, 32, 96>}, {pipeline_mode = #tpu.pipeline_mode<synchronous>, transform_indices = @transform_5, window_bounds = array<i64: 2, 1, 96>}, {pipeline_mode = #tpu.pipeline_mode<synchronous>, transform_indices = @transform_6, window_bounds = array<i64: 2, 32, 32>}, {pipeline_mode = #tpu.pipeline_mode<synchronous>, transform_indices = @transform_7, window_bounds = array<i64: 2, 1, 32>}, {pipeline_mode = #tpu.pipeline_mode<synchronous>, transform_indices = @transform_8, window_bounds = array<i64: 2, 1, 32>}, {pipeline_mode = #tpu.pipeline_mode<synchronous>, transform_indices = @transform_9, window_bounds = array<i64: 2, 1, 32>}, {pipeline_mode = #tpu.pipeline_mode<synchronous>, transform_indices = @transform_10, window_bounds = array<i64: 2, 32, 64>}, {pipeline_mode = #tpu.pipeline_mode<synchronous>, transform_indices = @transform_11, window_bounds = array<i64: 2, 1, 64>}, {pipeline_mode = #tpu.pipeline_mode<synchronous>, transform_indices = @transform_12, window_bounds = array<i64: 2, 64, 32>}, {pipeline_mode = #tpu.pipeline_mode<synchronous>, transform_indices = @transform_13, window_bounds = array<i64: 2, 1, 32>}, {pipeline_mode = #tpu.pipeline_mode<synchronous>, transform_indices = @transform_14, window_bounds = array<i64: 2, 1, 32>}, {pipeline_mode = #tpu.pipeline_mode<synchronous>, transform_indices = @transform_15, window_bounds = array<i64: 2, 1, 32>}, {pipeline_mode = #tpu.pipeline_mode<synchronous>, transform_indices = @transform_16, window_bounds = array<i64: 32, 32>}, {pipeline_mode = #tpu.pipeline_mode<synchronous>, transform_indices = @transform_17, window_bounds = array<i64: 1, 32>}, {pipeline_mode = #tpu.pipeline_mode<synchronous>, transform_indices = @transform_18, window_bounds = array<i64: 32, 3>}, {pipeline_mode = #tpu.pipeline_mode<synchronous>, transform_indices = @transform_19, window_bounds = array<i64: 1, 3>}, {transform_indices = @transform_20, window_bounds = array<i64: 1, 1, 3>}, {transform_indices = @transform_21, window_bounds = array<i64: 1, 8, 128>}]} {
    %c0 = arith.constant 0 : index
    %c0_0 = arith.constant 0 : index
    %c0_1 = arith.constant 0 : index
    %0 = vector.load %arg1[%c0, %c0_0, %c0_1] : memref<1x8x32xf32, #tpu.memory_space<vmem>>, vector<1x8x32xf32>
    %1 = vector.shape_cast %0 : vector<1x8x32xf32> to vector<8x32xf32>
    %c0_2 = arith.constant 0 : index
    %c0_3 = arith.constant 0 : index
    %2 = vector.load %arg3[%c0_2, %c0_3] : memref<1x32xf32, #tpu.memory_space<vmem>>, vector<1x32xf32>
    %c0_4 = arith.constant 0 : index
    %c0_5 = arith.constant 0 : index
    %3 = vector.load %arg4[%c0_4, %c0_5] : memref<1x32xf32, #tpu.memory_space<vmem>>, vector<1x32xf32>
    %cst = arith.constant dense<0.000000e+00> : vector<8xf32>
    %4 = vector.multi_reduction <add>, %1, %cst [1] : vector<8x32xf32> to vector<8xf32>
    %5 = vector.shape_cast %4 : vector<8xf32> to vector<8x1xf32>
    %6 = arith.mulf %1, %1 : vector<8x32xf32>
    %cst_6 = arith.constant dense<0.000000e+00> : vector<8xf32>
    %7 = vector.multi_reduction <add>, %6, %cst_6 [1] : vector<8x32xf32> to vector<8xf32>
    %8 = vector.shape_cast %7 : vector<8xf32> to vector<8x1xf32>
    %cst_7 = arith.constant 3.125000e-02 : f32
    %9 = vector.broadcast %cst_7 : f32 to vector<8x1xf32>
    %10 = arith.mulf %5, %9 : vector<8x1xf32>
    %cst_8 = arith.constant 3.125000e-02 : f32
    %11 = vector.broadcast %cst_8 : f32 to vector<8x1xf32>
    %12 = arith.mulf %8, %11 : vector<8x1xf32>
    %13 = arith.mulf %10, %10 : vector<8x1xf32>
    %14 = arith.subf %12, %13 : vector<8x1xf32>
    %cst_9 = arith.constant 9.99999996E-13 : f32
    %15 = vector.broadcast %cst_9 : f32 to vector<8x1xf32>
    %16 = arith.addf %14, %15 : vector<8x1xf32>
    %17 = math.rsqrt %16 : vector<8x1xf32>
    %18 = vector.broadcast %10 : vector<8x1xf32> to vector<8x32xf32>
    %19 = arith.subf %1, %18 : vector<8x32xf32>
    %20 = vector.broadcast %17 : vector<8x1xf32> to vector<8x32xf32>
    %21 = arith.mulf %19, %20 : vector<8x32xf32>
    %22 = vector.broadcast %2 : vector<1x32xf32> to vector<8x32xf32>
    %23 = arith.mulf %21, %22 : vector<8x32xf32>
    %24 = vector.broadcast %3 : vector<1x32xf32> to vector<8x32xf32>
    %25 = arith.addf %23, %24 : vector<8x32xf32>
    %c0_10 = arith.constant 0 : index
    %c0_11 = arith.constant 0 : index
    %c0_12 = arith.constant 0 : index
    %26 = vector.load %arg2[%c0_10, %c0_11, %c0_12] : memref<1x1x8xf32, #tpu.memory_space<vmem>>, vector<1x1x8xf32>
    %27 = vector.shape_cast %26 : vector<1x1x8xf32> to vector<1x8xf32>
    %cst_13 = arith.constant 1.000000e+00 : f32
    %28 = vector.broadcast %cst_13 : f32 to vector<1x8xf32>
    %29 = arith.subf %28, %27 : vector<1x8xf32>
    %cst_14 = arith.constant -1.000000e+09 : f32
    %30 = vector.broadcast %cst_14 : f32 to vector<1x8xf32>
    %31 = arith.mulf %29, %30 : vector<1x8xf32>
    %32 = vector.shape_cast %31 : vector<1x8xf32> to vector<1x1x8xf32>
    %33 = vector.shape_cast %32 : vector<1x1x8xf32> to vector<1x1x8xf32>
    %34 = vector.broadcast %33 : vector<1x1x8xf32> to vector<2x8x8xf32>
    %c0_15 = arith.constant 0 : index
    %c0_16 = arith.constant 0 : index
    %c0_17 = arith.constant 0 : index
    %35 = vector.load %arg5[%c0_15, %c0_16, %c0_17] : memref<2x32x96xf32, #tpu.memory_space<vmem>>, vector<1x32x96xf32>
    %36 = vector.shape_cast %35 : vector<1x32x96xf32> to vector<32x96xf32>
    %cst_18 = arith.constant dense<0.000000e+00> : vector<8x96xf32>
    %37 = tpu.matmul %25, %36, %cst_18 {dimension_numbers = #tpu.dot_dimension_numbers<[1], [0], [0], [1], [0, 0, 1, 1], [], []>} : vector<8x32xf32>, vector<32x96xf32>, vector<8x96xf32> -> vector<8x96xf32>
    %c0_19 = arith.constant 0 : index
    %c0_20 = arith.constant 0 : index
    %c0_21 = arith.constant 0 : index
    %38 = vector.load %arg6[%c0_19, %c0_20, %c0_21] : memref<2x1x96xf32, #tpu.memory_space<vmem>>, vector<1x1x96xf32>
    %39 = vector.shape_cast %38 : vector<1x1x96xf32> to vector<1x96xf32>
    %40 = vector.broadcast %39 : vector<1x96xf32> to vector<8x96xf32>
    %41 = arith.addf %37, %40 : vector<8x96xf32>
    %42 = vector.extract_strided_slice %41 {offsets = [0, 0], sizes = [8, 32], strides = [1, 1]} : vector<8x96xf32> to vector<8x32xf32>
    %43 = vector.shape_cast %42 : vector<8x32xf32> to vector<8x2x16xf32>
    %44 = vector.extract_strided_slice %41 {offsets = [0, 32], sizes = [8, 32], strides = [1, 1]} : vector<8x96xf32> to vector<8x32xf32>
    %45 = vector.shape_cast %44 : vector<8x32xf32> to vector<8x2x16xf32>
    %46 = vector.extract_strided_slice %41 {offsets = [0, 64], sizes = [8, 32], strides = [1, 1]} : vector<8x96xf32> to vector<8x32xf32>
    %47 = vector.shape_cast %46 : vector<8x32xf32> to vector<8x2x16xf32>
    "tpu.trace_start"() <{level = 10 : i32, message = "qhd,khd->hqk"}> : () -> ()
    %cst_22 = arith.constant dense<0.000000e+00> : vector<2x8x8xf32>
    %48 = tpu.matmul %43, %45, %cst_22 {dimension_numbers = #tpu.dot_dimension_numbers<[2], [2], [0], [0], [0, 1, 0, 0, 1, 0], [1], [1]>} : vector<8x2x16xf32>, vector<8x2x16xf32>, vector<2x8x8xf32> -> vector<2x8x8xf32>
    "tpu.trace_stop"() : () -> ()
    %cst_23 = arith.constant 2.500000e-01 : f32
    %49 = vector.broadcast %cst_23 : f32 to vector<2x8x8xf32>
    %50 = arith.mulf %48, %49 : vector<2x8x8xf32>
    %51 = arith.addf %50, %34 : vector<2x8x8xf32>
    %cst_24 = arith.constant dense<0xFF800000> : vector<2x8xf32>
    %52 = vector.multi_reduction <maximumf>, %51, %cst_24 [2] : vector<2x8x8xf32> to vector<2x8xf32>
    %53 = vector.shape_cast %52 : vector<2x8xf32> to vector<2x8x1xf32>
    %54 = vector.broadcast %53 : vector<2x8x1xf32> to vector<2x8x8xf32>
    %55 = arith.subf %51, %54 : vector<2x8x8xf32>
    %56 = math.exp %55 : vector<2x8x8xf32>
    %cst_25 = arith.constant dense<0.000000e+00> : vector<2x8xf32>
    %57 = vector.multi_reduction <add>, %56, %cst_25 [2] : vector<2x8x8xf32> to vector<2x8xf32>
    %58 = vector.shape_cast %57 : vector<2x8xf32> to vector<2x8x1xf32>
    %59 = vector.broadcast %58 : vector<2x8x1xf32> to vector<2x8x8xf32>
    %60 = arith.divf %56, %59 : vector<2x8x8xf32>
    "tpu.trace_start"() <{level = 10 : i32, message = "hqk,khd->qhd"}> : () -> ()
    %cst_26 = arith.constant dense<0.000000e+00> : vector<2x16x8xf32>
    %61 = tpu.matmul %47, %60, %cst_26 {dimension_numbers = #tpu.dot_dimension_numbers<[0], [2], [2], [1], [0, 1, 0, 2, 1, 1], [1], [0]>} : vector<8x2x16xf32>, vector<2x8x8xf32>, vector<2x16x8xf32> -> vector<2x16x8xf32>
    %62 = tpu.transpose %61, [2, 0, 1] : vector<2x16x8xf32> -> vector<8x2x16xf32>
    "tpu.trace_stop"() : () -> ()
    %63 = vector.shape_cast %62 : vector<8x2x16xf32> to vector<8x32xf32>
    %c0_27 = arith.constant 0 : index
    %c0_28 = arith.constant 0 : index
    %c0_29 = arith.constant 0 : index
    %64 = vector.load %arg7[%c0_27, %c0_28, %c0_29] : memref<2x32x32xf32, #tpu.memory_space<vmem>>, vector<1x32x32xf32>
    %65 = vector.shape_cast %64 : vector<1x32x32xf32> to vector<32x32xf32>
    %cst_30 = arith.constant dense<0.000000e+00> : vector<8x32xf32>
    %66 = tpu.matmul %63, %65, %cst_30 {dimension_numbers = #tpu.dot_dimension_numbers<[1], [0], [0], [1], [0, 0, 1, 1], [], []>} : vector<8x32xf32>, vector<32x32xf32>, vector<8x32xf32> -> vector<8x32xf32>
    %c0_31 = arith.constant 0 : index
    %c0_32 = arith.constant 0 : index
    %c0_33 = arith.constant 0 : index
    %67 = vector.load %arg8[%c0_31, %c0_32, %c0_33] : memref<2x1x32xf32, #tpu.memory_space<vmem>>, vector<1x1x32xf32>
    %68 = vector.shape_cast %67 : vector<1x1x32xf32> to vector<1x32xf32>
    %69 = vector.broadcast %68 : vector<1x32xf32> to vector<8x32xf32>
    %70 = arith.addf %66, %69 : vector<8x32xf32>
    %71 = arith.addf %25, %70 : vector<8x32xf32>
    %c0_34 = arith.constant 0 : index
    %c0_35 = arith.constant 0 : index
    %c0_36 = arith.constant 0 : index
    %72 = vector.load %arg9[%c0_34, %c0_35, %c0_36] : memref<2x1x32xf32, #tpu.memory_space<vmem>>, vector<1x1x32xf32>
    %73 = vector.shape_cast %72 : vector<1x1x32xf32> to vector<1x32xf32>
    %c0_37 = arith.constant 0 : index
    %c0_38 = arith.constant 0 : index
    %c0_39 = arith.constant 0 : index
    %74 = vector.load %arg10[%c0_37, %c0_38, %c0_39] : memref<2x1x32xf32, #tpu.memory_space<vmem>>, vector<1x1x32xf32>
    %75 = vector.shape_cast %74 : vector<1x1x32xf32> to vector<1x32xf32>
    %cst_40 = arith.constant dense<0.000000e+00> : vector<8xf32>
    %76 = vector.multi_reduction <add>, %71, %cst_40 [1] : vector<8x32xf32> to vector<8xf32>
    %77 = vector.shape_cast %76 : vector<8xf32> to vector<8x1xf32>
    %78 = arith.mulf %71, %71 : vector<8x32xf32>
    %cst_41 = arith.constant dense<0.000000e+00> : vector<8xf32>
    %79 = vector.multi_reduction <add>, %78, %cst_41 [1] : vector<8x32xf32> to vector<8xf32>
    %80 = vector.shape_cast %79 : vector<8xf32> to vector<8x1xf32>
    %cst_42 = arith.constant 3.125000e-02 : f32
    %81 = vector.broadcast %cst_42 : f32 to vector<8x1xf32>
    %82 = arith.mulf %77, %81 : vector<8x1xf32>
    %cst_43 = arith.constant 3.125000e-02 : f32
    %83 = vector.broadcast %cst_43 : f32 to vector<8x1xf32>
    %84 = arith.mulf %80, %83 : vector<8x1xf32>
    %85 = arith.mulf %82, %82 : vector<8x1xf32>
    %86 = arith.subf %84, %85 : vector<8x1xf32>
    %cst_44 = arith.constant 9.99999996E-13 : f32
    %87 = vector.broadcast %cst_44 : f32 to vector<8x1xf32>
    %88 = arith.addf %86, %87 : vector<8x1xf32>
    %89 = math.rsqrt %88 : vector<8x1xf32>
    %90 = vector.broadcast %82 : vector<8x1xf32> to vector<8x32xf32>
    %91 = arith.subf %71, %90 : vector<8x32xf32>
    %92 = vector.broadcast %89 : vector<8x1xf32> to vector<8x32xf32>
    %93 = arith.mulf %91, %92 : vector<8x32xf32>
    %94 = vector.broadcast %73 : vector<1x32xf32> to vector<8x32xf32>
    %95 = arith.mulf %93, %94 : vector<8x32xf32>
    %96 = vector.broadcast %75 : vector<1x32xf32> to vector<8x32xf32>
    %97 = arith.addf %95, %96 : vector<8x32xf32>
    %c0_45 = arith.constant 0 : index
    %c0_46 = arith.constant 0 : index
    %c0_47 = arith.constant 0 : index
    %98 = vector.load %arg11[%c0_45, %c0_46, %c0_47] : memref<2x32x64xf32, #tpu.memory_space<vmem>>, vector<1x32x64xf32>
    %99 = vector.shape_cast %98 : vector<1x32x64xf32> to vector<32x64xf32>
    %cst_48 = arith.constant dense<0.000000e+00> : vector<8x64xf32>
    %100 = tpu.matmul %97, %99, %cst_48 {dimension_numbers = #tpu.dot_dimension_numbers<[1], [0], [0], [1], [0, 0, 1, 1], [], []>} : vector<8x32xf32>, vector<32x64xf32>, vector<8x64xf32> -> vector<8x64xf32>
    %c0_49 = arith.constant 0 : index
    %c0_50 = arith.constant 0 : index
    %c0_51 = arith.constant 0 : index
    %101 = vector.load %arg12[%c0_49, %c0_50, %c0_51] : memref<2x1x64xf32, #tpu.memory_space<vmem>>, vector<1x1x64xf32>
    %102 = vector.shape_cast %101 : vector<1x1x64xf32> to vector<1x64xf32>
    %103 = vector.broadcast %102 : vector<1x64xf32> to vector<8x64xf32>
    %104 = arith.addf %100, %103 : vector<8x64xf32>
    %105 = arith.mulf %104, %104 : vector<8x64xf32>
    %106 = arith.mulf %104, %105 : vector<8x64xf32>
    %cst_52 = arith.constant 4.471500e-02 : f32
    %107 = vector.broadcast %cst_52 : f32 to vector<8x64xf32>
    %108 = arith.mulf %107, %106 : vector<8x64xf32>
    %109 = arith.addf %104, %108 : vector<8x64xf32>
    %cst_53 = arith.constant 0.797884583 : f32
    %110 = vector.broadcast %cst_53 : f32 to vector<8x64xf32>
    %111 = arith.mulf %110, %109 : vector<8x64xf32>
    %112 = math.tanh %111 : vector<8x64xf32>
    %cst_54 = arith.constant 1.000000e+00 : f32
    %113 = vector.broadcast %cst_54 : f32 to vector<8x64xf32>
    %114 = arith.addf %113, %112 : vector<8x64xf32>
    %cst_55 = arith.constant 5.000000e-01 : f32
    %115 = vector.broadcast %cst_55 : f32 to vector<8x64xf32>
    %116 = arith.mulf %115, %114 : vector<8x64xf32>
    %117 = arith.mulf %104, %116 : vector<8x64xf32>
    %c0_56 = arith.constant 0 : index
    %c0_57 = arith.constant 0 : index
    %c0_58 = arith.constant 0 : index
    %118 = vector.load %arg13[%c0_56, %c0_57, %c0_58] : memref<2x64x32xf32, #tpu.memory_space<vmem>>, vector<1x64x32xf32>
    %119 = vector.shape_cast %118 : vector<1x64x32xf32> to vector<64x32xf32>
    %cst_59 = arith.constant dense<0.000000e+00> : vector<8x32xf32>
    %120 = tpu.matmul %117, %119, %cst_59 {dimension_numbers = #tpu.dot_dimension_numbers<[1], [0], [0], [1], [0, 0, 1, 1], [], []>} : vector<8x64xf32>, vector<64x32xf32>, vector<8x32xf32> -> vector<8x32xf32>
    %c0_60 = arith.constant 0 : index
    %c0_61 = arith.constant 0 : index
    %c0_62 = arith.constant 0 : index
    %121 = vector.load %arg14[%c0_60, %c0_61, %c0_62] : memref<2x1x32xf32, #tpu.memory_space<vmem>>, vector<1x1x32xf32>
    %122 = vector.shape_cast %121 : vector<1x1x32xf32> to vector<1x32xf32>
    %123 = vector.broadcast %122 : vector<1x32xf32> to vector<8x32xf32>
    %124 = arith.addf %120, %123 : vector<8x32xf32>
    %125 = arith.addf %97, %124 : vector<8x32xf32>
    %c0_63 = arith.constant 0 : index
    %c0_64 = arith.constant 0 : index
    %c0_65 = arith.constant 0 : index
    %126 = vector.load %arg15[%c0_63, %c0_64, %c0_65] : memref<2x1x32xf32, #tpu.memory_space<vmem>>, vector<1x1x32xf32>
    %127 = vector.shape_cast %126 : vector<1x1x32xf32> to vector<1x32xf32>
    %c0_66 = arith.constant 0 : index
    %c0_67 = arith.constant 0 : index
    %c0_68 = arith.constant 0 : index
    %128 = vector.load %arg16[%c0_66, %c0_67, %c0_68] : memref<2x1x32xf32, #tpu.memory_space<vmem>>, vector<1x1x32xf32>
    %129 = vector.shape_cast %128 : vector<1x1x32xf32> to vector<1x32xf32>
    %cst_69 = arith.constant dense<0.000000e+00> : vector<8xf32>
    %130 = vector.multi_reduction <add>, %125, %cst_69 [1] : vector<8x32xf32> to vector<8xf32>
    %131 = vector.shape_cast %130 : vector<8xf32> to vector<8x1xf32>
    %132 = arith.mulf %125, %125 : vector<8x32xf32>
    %cst_70 = arith.constant dense<0.000000e+00> : vector<8xf32>
    %133 = vector.multi_reduction <add>, %132, %cst_70 [1] : vector<8x32xf32> to vector<8xf32>
    %134 = vector.shape_cast %133 : vector<8xf32> to vector<8x1xf32>
    %cst_71 = arith.constant 3.125000e-02 : f32
    %135 = vector.broadcast %cst_71 : f32 to vector<8x1xf32>
    %136 = arith.mulf %131, %135 : vector<8x1xf32>
    %cst_72 = arith.constant 3.125000e-02 : f32
    %137 = vector.broadcast %cst_72 : f32 to vector<8x1xf32>
    %138 = arith.mulf %134, %137 : vector<8x1xf32>
    %139 = arith.mulf %136, %136 : vector<8x1xf32>
    %140 = arith.subf %138, %139 : vector<8x1xf32>
    %cst_73 = arith.constant 9.99999996E-13 : f32
    %141 = vector.broadcast %cst_73 : f32 to vector<8x1xf32>
    %142 = arith.addf %140, %141 : vector<8x1xf32>
    %143 = math.rsqrt %142 : vector<8x1xf32>
    %144 = vector.broadcast %136 : vector<8x1xf32> to vector<8x32xf32>
    %145 = arith.subf %125, %144 : vector<8x32xf32>
    %146 = vector.broadcast %143 : vector<8x1xf32> to vector<8x32xf32>
    %147 = arith.mulf %145, %146 : vector<8x32xf32>
    %148 = vector.broadcast %127 : vector<1x32xf32> to vector<8x32xf32>
    %149 = arith.mulf %147, %148 : vector<8x32xf32>
    %150 = vector.broadcast %129 : vector<1x32xf32> to vector<8x32xf32>
    %151 = arith.addf %149, %150 : vector<8x32xf32>
    %c1 = arith.constant 1 : index
    %c0_74 = arith.constant 0 : index
    %c0_75 = arith.constant 0 : index
    %152 = vector.load %arg5[%c1, %c0_74, %c0_75] : memref<2x32x96xf32, #tpu.memory_space<vmem>>, vector<1x32x96xf32>
    %153 = vector.shape_cast %152 : vector<1x32x96xf32> to vector<32x96xf32>
    %cst_76 = arith.constant dense<0.000000e+00> : vector<8x96xf32>
    %154 = tpu.matmul %151, %153, %cst_76 {dimension_numbers = #tpu.dot_dimension_numbers<[1], [0], [0], [1], [0, 0, 1, 1], [], []>} : vector<8x32xf32>, vector<32x96xf32>, vector<8x96xf32> -> vector<8x96xf32>
    %c1_77 = arith.constant 1 : index
    %c0_78 = arith.constant 0 : index
    %c0_79 = arith.constant 0 : index
    %155 = vector.load %arg6[%c1_77, %c0_78, %c0_79] : memref<2x1x96xf32, #tpu.memory_space<vmem>>, vector<1x1x96xf32>
    %156 = vector.shape_cast %155 : vector<1x1x96xf32> to vector<1x96xf32>
    %157 = vector.broadcast %156 : vector<1x96xf32> to vector<8x96xf32>
    %158 = arith.addf %154, %157 : vector<8x96xf32>
    %159 = vector.extract_strided_slice %158 {offsets = [0, 0], sizes = [8, 32], strides = [1, 1]} : vector<8x96xf32> to vector<8x32xf32>
    %160 = vector.shape_cast %159 : vector<8x32xf32> to vector<8x2x16xf32>
    %161 = vector.extract_strided_slice %158 {offsets = [0, 32], sizes = [8, 32], strides = [1, 1]} : vector<8x96xf32> to vector<8x32xf32>
    %162 = vector.shape_cast %161 : vector<8x32xf32> to vector<8x2x16xf32>
    %163 = vector.extract_strided_slice %158 {offsets = [0, 64], sizes = [8, 32], strides = [1, 1]} : vector<8x96xf32> to vector<8x32xf32>
    %164 = vector.shape_cast %163 : vector<8x32xf32> to vector<8x2x16xf32>
    "tpu.trace_start"() <{level = 10 : i32, message = "qhd,khd->hqk"}> : () -> ()
    %cst_80 = arith.constant dense<0.000000e+00> : vector<2x8x8xf32>
    %165 = tpu.matmul %160, %162, %cst_80 {dimension_numbers = #tpu.dot_dimension_numbers<[2], [2], [0], [0], [0, 1, 0, 0, 1, 0], [1], [1]>} : vector<8x2x16xf32>, vector<8x2x16xf32>, vector<2x8x8xf32> -> vector<2x8x8xf32>
    "tpu.trace_stop"() : () -> ()
    %cst_81 = arith.constant 2.500000e-01 : f32
    %166 = vector.broadcast %cst_81 : f32 to vector<2x8x8xf32>
    %167 = arith.mulf %165, %166 : vector<2x8x8xf32>
    %168 = arith.addf %167, %34 : vector<2x8x8xf32>
    %cst_82 = arith.constant dense<0xFF800000> : vector<2x8xf32>
    %169 = vector.multi_reduction <maximumf>, %168, %cst_82 [2] : vector<2x8x8xf32> to vector<2x8xf32>
    %170 = vector.shape_cast %169 : vector<2x8xf32> to vector<2x8x1xf32>
    %171 = vector.broadcast %170 : vector<2x8x1xf32> to vector<2x8x8xf32>
    %172 = arith.subf %168, %171 : vector<2x8x8xf32>
    %173 = math.exp %172 : vector<2x8x8xf32>
    %cst_83 = arith.constant dense<0.000000e+00> : vector<2x8xf32>
    %174 = vector.multi_reduction <add>, %173, %cst_83 [2] : vector<2x8x8xf32> to vector<2x8xf32>
    %175 = vector.shape_cast %174 : vector<2x8xf32> to vector<2x8x1xf32>
    %176 = vector.broadcast %175 : vector<2x8x1xf32> to vector<2x8x8xf32>
    %177 = arith.divf %173, %176 : vector<2x8x8xf32>
    "tpu.trace_start"() <{level = 10 : i32, message = "hqk,khd->qhd"}> : () -> ()
    %cst_84 = arith.constant dense<0.000000e+00> : vector<2x16x8xf32>
    %178 = tpu.matmul %164, %177, %cst_84 {dimension_numbers = #tpu.dot_dimension_numbers<[0], [2], [2], [1], [0, 1, 0, 2, 1, 1], [1], [0]>} : vector<8x2x16xf32>, vector<2x8x8xf32>, vector<2x16x8xf32> -> vector<2x16x8xf32>
    %179 = tpu.transpose %178, [2, 0, 1] : vector<2x16x8xf32> -> vector<8x2x16xf32>
    "tpu.trace_stop"() : () -> ()
    %180 = vector.shape_cast %179 : vector<8x2x16xf32> to vector<8x32xf32>
    %c1_85 = arith.constant 1 : index
    %c0_86 = arith.constant 0 : index
    %c0_87 = arith.constant 0 : index
    %181 = vector.load %arg7[%c1_85, %c0_86, %c0_87] : memref<2x32x32xf32, #tpu.memory_space<vmem>>, vector<1x32x32xf32>
    %182 = vector.shape_cast %181 : vector<1x32x32xf32> to vector<32x32xf32>
    %cst_88 = arith.constant dense<0.000000e+00> : vector<8x32xf32>
    %183 = tpu.matmul %180, %182, %cst_88 {dimension_numbers = #tpu.dot_dimension_numbers<[1], [0], [0], [1], [0, 0, 1, 1], [], []>} : vector<8x32xf32>, vector<32x32xf32>, vector<8x32xf32> -> vector<8x32xf32>
    %c1_89 = arith.constant 1 : index
    %c0_90 = arith.constant 0 : index
    %c0_91 = arith.constant 0 : index
    %184 = vector.load %arg8[%c1_89, %c0_90, %c0_91] : memref<2x1x32xf32, #tpu.memory_space<vmem>>, vector<1x1x32xf32>
    %185 = vector.shape_cast %184 : vector<1x1x32xf32> to vector<1x32xf32>
    %186 = vector.broadcast %185 : vector<1x32xf32> to vector<8x32xf32>
    %187 = arith.addf %183, %186 : vector<8x32xf32>
    %188 = arith.addf %151, %187 : vector<8x32xf32>
    %c1_92 = arith.constant 1 : index
    %c0_93 = arith.constant 0 : index
    %c0_94 = arith.constant 0 : index
    %189 = vector.load %arg9[%c1_92, %c0_93, %c0_94] : memref<2x1x32xf32, #tpu.memory_space<vmem>>, vector<1x1x32xf32>
    %190 = vector.shape_cast %189 : vector<1x1x32xf32> to vector<1x32xf32>
    %c1_95 = arith.constant 1 : index
    %c0_96 = arith.constant 0 : index
    %c0_97 = arith.constant 0 : index
    %191 = vector.load %arg10[%c1_95, %c0_96, %c0_97] : memref<2x1x32xf32, #tpu.memory_space<vmem>>, vector<1x1x32xf32>
    %192 = vector.shape_cast %191 : vector<1x1x32xf32> to vector<1x32xf32>
    %cst_98 = arith.constant dense<0.000000e+00> : vector<8xf32>
    %193 = vector.multi_reduction <add>, %188, %cst_98 [1] : vector<8x32xf32> to vector<8xf32>
    %194 = vector.shape_cast %193 : vector<8xf32> to vector<8x1xf32>
    %195 = arith.mulf %188, %188 : vector<8x32xf32>
    %cst_99 = arith.constant dense<0.000000e+00> : vector<8xf32>
    %196 = vector.multi_reduction <add>, %195, %cst_99 [1] : vector<8x32xf32> to vector<8xf32>
    %197 = vector.shape_cast %196 : vector<8xf32> to vector<8x1xf32>
    %cst_100 = arith.constant 3.125000e-02 : f32
    %198 = vector.broadcast %cst_100 : f32 to vector<8x1xf32>
    %199 = arith.mulf %194, %198 : vector<8x1xf32>
    %cst_101 = arith.constant 3.125000e-02 : f32
    %200 = vector.broadcast %cst_101 : f32 to vector<8x1xf32>
    %201 = arith.mulf %197, %200 : vector<8x1xf32>
    %202 = arith.mulf %199, %199 : vector<8x1xf32>
    %203 = arith.subf %201, %202 : vector<8x1xf32>
    %cst_102 = arith.constant 9.99999996E-13 : f32
    %204 = vector.broadcast %cst_102 : f32 to vector<8x1xf32>
    %205 = arith.addf %203, %204 : vector<8x1xf32>
    %206 = math.rsqrt %205 : vector<8x1xf32>
    %207 = vector.broadcast %199 : vector<8x1xf32> to vector<8x32xf32>
    %208 = arith.subf %188, %207 : vector<8x32xf32>
    %209 = vector.broadcast %206 : vector<8x1xf32> to vector<8x32xf32>
    %210 = arith.mulf %208, %209 : vector<8x32xf32>
    %211 = vector.broadcast %190 : vector<1x32xf32> to vector<8x32xf32>
    %212 = arith.mulf %210, %211 : vector<8x32xf32>
    %213 = vector.broadcast %192 : vector<1x32xf32> to vector<8x32xf32>
    %214 = arith.addf %212, %213 : vector<8x32xf32>
    %c1_103 = arith.constant 1 : index
    %c0_104 = arith.constant 0 : index
    %c0_105 = arith.constant 0 : index
    %215 = vector.load %arg11[%c1_103, %c0_104, %c0_105] : memref<2x32x64xf32, #tpu.memory_space<vmem>>, vector<1x32x64xf32>
    %216 = vector.shape_cast %215 : vector<1x32x64xf32> to vector<32x64xf32>
    %cst_106 = arith.constant dense<0.000000e+00> : vector<8x64xf32>
    %217 = tpu.matmul %214, %216, %cst_106 {dimension_numbers = #tpu.dot_dimension_numbers<[1], [0], [0], [1], [0, 0, 1, 1], [], []>} : vector<8x32xf32>, vector<32x64xf32>, vector<8x64xf32> -> vector<8x64xf32>
    %c1_107 = arith.constant 1 : index
    %c0_108 = arith.constant 0 : index
    %c0_109 = arith.constant 0 : index
    %218 = vector.load %arg12[%c1_107, %c0_108, %c0_109] : memref<2x1x64xf32, #tpu.memory_space<vmem>>, vector<1x1x64xf32>
    %219 = vector.shape_cast %218 : vector<1x1x64xf32> to vector<1x64xf32>
    %220 = vector.broadcast %219 : vector<1x64xf32> to vector<8x64xf32>
    %221 = arith.addf %217, %220 : vector<8x64xf32>
    %222 = arith.mulf %221, %221 : vector<8x64xf32>
    %223 = arith.mulf %221, %222 : vector<8x64xf32>
    %cst_110 = arith.constant 4.471500e-02 : f32
    %224 = vector.broadcast %cst_110 : f32 to vector<8x64xf32>
    %225 = arith.mulf %224, %223 : vector<8x64xf32>
    %226 = arith.addf %221, %225 : vector<8x64xf32>
    %cst_111 = arith.constant 0.797884583 : f32
    %227 = vector.broadcast %cst_111 : f32 to vector<8x64xf32>
    %228 = arith.mulf %227, %226 : vector<8x64xf32>
    %229 = math.tanh %228 : vector<8x64xf32>
    %cst_112 = arith.constant 1.000000e+00 : f32
    %230 = vector.broadcast %cst_112 : f32 to vector<8x64xf32>
    %231 = arith.addf %230, %229 : vector<8x64xf32>
    %cst_113 = arith.constant 5.000000e-01 : f32
    %232 = vector.broadcast %cst_113 : f32 to vector<8x64xf32>
    %233 = arith.mulf %232, %231 : vector<8x64xf32>
    %234 = arith.mulf %221, %233 : vector<8x64xf32>
    %c1_114 = arith.constant 1 : index
    %c0_115 = arith.constant 0 : index
    %c0_116 = arith.constant 0 : index
    %235 = vector.load %arg13[%c1_114, %c0_115, %c0_116] : memref<2x64x32xf32, #tpu.memory_space<vmem>>, vector<1x64x32xf32>
    %236 = vector.shape_cast %235 : vector<1x64x32xf32> to vector<64x32xf32>
    %cst_117 = arith.constant dense<0.000000e+00> : vector<8x32xf32>
    %237 = tpu.matmul %234, %236, %cst_117 {dimension_numbers = #tpu.dot_dimension_numbers<[1], [0], [0], [1], [0, 0, 1, 1], [], []>} : vector<8x64xf32>, vector<64x32xf32>, vector<8x32xf32> -> vector<8x32xf32>
    %c1_118 = arith.constant 1 : index
    %c0_119 = arith.constant 0 : index
    %c0_120 = arith.constant 0 : index
    %238 = vector.load %arg14[%c1_118, %c0_119, %c0_120] : memref<2x1x32xf32, #tpu.memory_space<vmem>>, vector<1x1x32xf32>
    %239 = vector.shape_cast %238 : vector<1x1x32xf32> to vector<1x32xf32>
    %240 = vector.broadcast %239 : vector<1x32xf32> to vector<8x32xf32>
    %241 = arith.addf %237, %240 : vector<8x32xf32>
    %242 = arith.addf %214, %241 : vector<8x32xf32>
    %c1_121 = arith.constant 1 : index
    %c0_122 = arith.constant 0 : index
    %c0_123 = arith.constant 0 : index
    %243 = vector.load %arg15[%c1_121, %c0_122, %c0_123] : memref<2x1x32xf32, #tpu.memory_space<vmem>>, vector<1x1x32xf32>
    %244 = vector.shape_cast %243 : vector<1x1x32xf32> to vector<1x32xf32>
    %c1_124 = arith.constant 1 : index
    %c0_125 = arith.constant 0 : index
    %c0_126 = arith.constant 0 : index
    %245 = vector.load %arg16[%c1_124, %c0_125, %c0_126] : memref<2x1x32xf32, #tpu.memory_space<vmem>>, vector<1x1x32xf32>
    %246 = vector.shape_cast %245 : vector<1x1x32xf32> to vector<1x32xf32>
    %cst_127 = arith.constant dense<0.000000e+00> : vector<8xf32>
    %247 = vector.multi_reduction <add>, %242, %cst_127 [1] : vector<8x32xf32> to vector<8xf32>
    %248 = vector.shape_cast %247 : vector<8xf32> to vector<8x1xf32>
    %249 = arith.mulf %242, %242 : vector<8x32xf32>
    %cst_128 = arith.constant dense<0.000000e+00> : vector<8xf32>
    %250 = vector.multi_reduction <add>, %249, %cst_128 [1] : vector<8x32xf32> to vector<8xf32>
    %251 = vector.shape_cast %250 : vector<8xf32> to vector<8x1xf32>
    %cst_129 = arith.constant 3.125000e-02 : f32
    %252 = vector.broadcast %cst_129 : f32 to vector<8x1xf32>
    %253 = arith.mulf %248, %252 : vector<8x1xf32>
    %cst_130 = arith.constant 3.125000e-02 : f32
    %254 = vector.broadcast %cst_130 : f32 to vector<8x1xf32>
    %255 = arith.mulf %251, %254 : vector<8x1xf32>
    %256 = arith.mulf %253, %253 : vector<8x1xf32>
    %257 = arith.subf %255, %256 : vector<8x1xf32>
    %cst_131 = arith.constant 9.99999996E-13 : f32
    %258 = vector.broadcast %cst_131 : f32 to vector<8x1xf32>
    %259 = arith.addf %257, %258 : vector<8x1xf32>
    %260 = math.rsqrt %259 : vector<8x1xf32>
    %261 = vector.broadcast %253 : vector<8x1xf32> to vector<8x32xf32>
    %262 = arith.subf %242, %261 : vector<8x32xf32>
    %263 = vector.broadcast %260 : vector<8x1xf32> to vector<8x32xf32>
    %264 = arith.mulf %262, %263 : vector<8x32xf32>
    %265 = vector.broadcast %244 : vector<1x32xf32> to vector<8x32xf32>
    %266 = arith.mulf %264, %265 : vector<8x32xf32>
    %267 = vector.broadcast %246 : vector<1x32xf32> to vector<8x32xf32>
    %268 = arith.addf %266, %267 : vector<8x32xf32>
    %269 = vector.extract_strided_slice %268 {offsets = [0, 0], sizes = [1, 32], strides = [1, 1]} : vector<8x32xf32> to vector<1x32xf32>
    %c0_132 = arith.constant 0 : index
    %c0_133 = arith.constant 0 : index
    %270 = vector.load %arg17[%c0_132, %c0_133] : memref<32x32xf32, #tpu.memory_space<vmem>>, vector<32x32xf32>
    %cst_134 = arith.constant dense<0.000000e+00> : vector<1x32xf32>
    %271 = tpu.matmul %269, %270, %cst_134 {dimension_numbers = #tpu.dot_dimension_numbers<[1], [0], [0], [1], [0, 0, 1, 1], [], []>} : vector<1x32xf32>, vector<32x32xf32>, vector<1x32xf32> -> vector<1x32xf32>
    %c0_135 = arith.constant 0 : index
    %c0_136 = arith.constant 0 : index
    %272 = vector.load %arg18[%c0_135, %c0_136] : memref<1x32xf32, #tpu.memory_space<vmem>>, vector<1x32xf32>
    %273 = arith.addf %271, %272 : vector<1x32xf32>
    %274 = math.tanh %273 : vector<1x32xf32>
    %c0_137 = arith.constant 0 : index
    %c0_138 = arith.constant 0 : index
    %275 = vector.load %arg19[%c0_137, %c0_138] : memref<32x3xf32, #tpu.memory_space<vmem>>, vector<32x3xf32>
    %cst_139 = arith.constant dense<0.000000e+00> : vector<1x3xf32>
    %276 = tpu.matmul %274, %275, %cst_139 {dimension_numbers = #tpu.dot_dimension_numbers<[1], [0], [0], [1], [0, 0, 1, 1], [], []>} : vector<1x32xf32>, vector<32x3xf32>, vector<1x3xf32> -> vector<1x3xf32>
    %c0_140 = arith.constant 0 : index
    %c0_141 = arith.constant 0 : index
    %277 = vector.load %arg20[%c0_140, %c0_141] : memref<1x3xf32, #tpu.memory_space<vmem>>, vector<1x3xf32>
    %278 = arith.addf %276, %277 : vector<1x3xf32>
    %cst_142 = arith.constant dense<0xFF800000> : vector<1xf32>
    %279 = vector.multi_reduction <maximumf>, %278, %cst_142 [1] : vector<1x3xf32> to vector<1xf32>
    %280 = vector.shape_cast %279 : vector<1xf32> to vector<1x1xf32>
    %281 = vector.broadcast %280 : vector<1x1xf32> to vector<1x3xf32>
    %282 = arith.subf %278, %281 : vector<1x3xf32>
    %283 = math.exp %282 : vector<1x3xf32>
    %cst_143 = arith.constant dense<0.000000e+00> : vector<1xf32>
    %284 = vector.multi_reduction <add>, %283, %cst_143 [1] : vector<1x3xf32> to vector<1xf32>
    %285 = vector.shape_cast %284 : vector<1xf32> to vector<1x1xf32>
    %286 = math.log %285 : vector<1x1xf32>
    %287 = arith.addf %280, %286 : vector<1x1xf32>
    %c0_144 = arith.constant 0 : index
    %c0_145 = arith.constant 0 : index
    %c0_146 = arith.constant 0 : index
    %288 = vector.load %arg21[%c0_144, %c0_145, %c0_146] : memref<1x1x3xf32, #tpu.memory_space<vmem>>, vector<1x1x3xf32>
    %289 = vector.shape_cast %288 : vector<1x1x3xf32> to vector<1x3xf32>
    %290 = arith.mulf %289, %278 : vector<1x3xf32>
    %cst_147 = arith.constant dense<0.000000e+00> : vector<1xf32>
    %291 = vector.multi_reduction <add>, %290, %cst_147 [1] : vector<1x3xf32> to vector<1xf32>
    %292 = vector.shape_cast %291 : vector<1xf32> to vector<1x1xf32>
    %293 = arith.subf %287, %292 : vector<1x1xf32>
    %cst_148 = arith.constant 0.000000e+00 : f32
    %294 = vector.broadcast %cst_148 : f32 to vector<1x125xf32>
    %295 = tpu.concatenate %278, %294 in 1 : vector<1x3xf32>, vector<1x125xf32> -> vector<1x128xf32>
    %cst_149 = arith.constant 0.000000e+00 : f32
    %296 = vector.broadcast %cst_149 : f32 to vector<1x127xf32>
    %297 = tpu.concatenate %293, %296 in 1 : vector<1x1xf32>, vector<1x127xf32> -> vector<1x128xf32>
    %cst_150 = arith.constant 0.000000e+00 : f32
    %298 = vector.broadcast %cst_150 : f32 to vector<6x128xf32>
    %299 = tpu.concatenate %295, %297, %298 in 0 : vector<1x128xf32>, vector<1x128xf32>, vector<6x128xf32> -> vector<8x128xf32>
    %300 = vector.shape_cast %299 : vector<8x128xf32> to vector<1x8x128xf32>
    %c0_151 = arith.constant 0 : index
    %c0_152 = arith.constant 0 : index
    %c0_153 = arith.constant 0 : index
    %301 = vector.load %arg22[%c0_151, %c0_152, %c0_153] : memref<1x8x128xf32, #tpu.memory_space<vmem>>, vector<1x8x128xf32>
    tpu.vector_store %arg22[%c0_151, %c0_152, %c0_153], %300 {strides = array<i32>} : memref<1x8x128xf32, #tpu.memory_space<vmem>>, vector<1x8x128xf32>,
    return
  }
  func.func @transform_0(%arg0: i32) -> (i32, i32, i32) {
    %c0_i32 = arith.constant 0 : i32
    %c0_i32_0 = arith.constant 0 : i32
    %c0_i32_1 = arith.constant 0 : i32
    return %arg0, %c0_i32, %c0_i32_0 : i32, i32, i32
  }
  func.func @transform_1(%arg0: i32) -> (i32, i32, i32) {
    %c0_i32 = arith.constant 0 : i32
    %c0_i32_0 = arith.constant 0 : i32
    %c0_i32_1 = arith.constant 0 : i32
    return %arg0, %c0_i32, %c0_i32_0 : i32, i32, i32
  }
  func.func @transform_2(%arg0: i32) -> (i32, i32) {
    %c0_i32 = arith.constant 0 : i32
    %c0_i32_0 = arith.constant 0 : i32
    %c0_i32_1 = arith.constant 0 : i32
    return %c0_i32, %c0_i32_0 : i32, i32
  }
  func.func @transform_3(%arg0: i32) -> (i32, i32) {
    %c0_i32 = arith.constant 0 : i32
    %c0_i32_0 = arith.constant 0 : i32
    %c0_i32_1 = arith.constant 0 : i32
    return %c0_i32, %c0_i32_0 : i32, i32
  }
  func.func @transform_4(%arg0: i32) -> (i32, i32, i32) {
    %c0_i32 = arith.constant 0 : i32
    %c0_i32_0 = arith.constant 0 : i32
    %c0_i32_1 = arith.constant 0 : i32
    %c0_i32_2 = arith.constant 0 : i32
    return %c0_i32, %c0_i32_0, %c0_i32_1 : i32, i32, i32
  }
  func.func @transform_5(%arg0: i32) -> (i32, i32, i32) {
    %c0_i32 = arith.constant 0 : i32
    %c0_i32_0 = arith.constant 0 : i32
    %c0_i32_1 = arith.constant 0 : i32
    %c0_i32_2 = arith.constant 0 : i32
    return %c0_i32, %c0_i32_0, %c0_i32_1 : i32, i32, i32
  }
  func.func @transform_6(%arg0: i32) -> (i32, i32, i32) {
    %c0_i32 = arith.constant 0 : i32
    %c0_i32_0 = arith.constant 0 : i32
    %c0_i32_1 = arith.constant 0 : i32
    %c0_i32_2 = arith.constant 0 : i32
    return %c0_i32, %c0_i32_0, %c0_i32_1 : i32, i32, i32
  }
  func.func @transform_7(%arg0: i32) -> (i32, i32, i32) {
    %c0_i32 = arith.constant 0 : i32
    %c0_i32_0 = arith.constant 0 : i32
    %c0_i32_1 = arith.constant 0 : i32
    %c0_i32_2 = arith.constant 0 : i32
    return %c0_i32, %c0_i32_0, %c0_i32_1 : i32, i32, i32
  }
  func.func @transform_8(%arg0: i32) -> (i32, i32, i32) {
    %c0_i32 = arith.constant 0 : i32
    %c0_i32_0 = arith.constant 0 : i32
    %c0_i32_1 = arith.constant 0 : i32
    %c0_i32_2 = arith.constant 0 : i32
    return %c0_i32, %c0_i32_0, %c0_i32_1 : i32, i32, i32
  }
  func.func @transform_9(%arg0: i32) -> (i32, i32, i32) {
    %c0_i32 = arith.constant 0 : i32
    %c0_i32_0 = arith.constant 0 : i32
    %c0_i32_1 = arith.constant 0 : i32
    %c0_i32_2 = arith.constant 0 : i32
    return %c0_i32, %c0_i32_0, %c0_i32_1 : i32, i32, i32
  }
  func.func @transform_10(%arg0: i32) -> (i32, i32, i32) {
    %c0_i32 = arith.constant 0 : i32
    %c0_i32_0 = arith.constant 0 : i32
    %c0_i32_1 = arith.constant 0 : i32
    %c0_i32_2 = arith.constant 0 : i32
    return %c0_i32, %c0_i32_0, %c0_i32_1 : i32, i32, i32
  }
  func.func @transform_11(%arg0: i32) -> (i32, i32, i32) {
    %c0_i32 = arith.constant 0 : i32
    %c0_i32_0 = arith.constant 0 : i32
    %c0_i32_1 = arith.constant 0 : i32
    %c0_i32_2 = arith.constant 0 : i32
    return %c0_i32, %c0_i32_0, %c0_i32_1 : i32, i32, i32
  }
  func.func @transform_12(%arg0: i32) -> (i32, i32, i32) {
    %c0_i32 = arith.constant 0 : i32
    %c0_i32_0 = arith.constant 0 : i32
    %c0_i32_1 = arith.constant 0 : i32
    %c0_i32_2 = arith.constant 0 : i32
    return %c0_i32, %c0_i32_0, %c0_i32_1 : i32, i32, i32
  }
  func.func @transform_13(%arg0: i32) -> (i32, i32, i32) {
    %c0_i32 = arith.constant 0 : i32
    %c0_i32_0 = arith.constant 0 : i32
    %c0_i32_1 = arith.constant 0 : i32
    %c0_i32_2 = arith.constant 0 : i32
    return %c0_i32, %c0_i32_0, %c0_i32_1 : i32, i32, i32
  }
  func.func @transform_14(%arg0: i32) -> (i32, i32, i32) {
    %c0_i32 = arith.constant 0 : i32
    %c0_i32_0 = arith.constant 0 : i32
    %c0_i32_1 = arith.constant 0 : i32
    %c0_i32_2 = arith.constant 0 : i32
    return %c0_i32, %c0_i32_0, %c0_i32_1 : i32, i32, i32
  }
  func.func @transform_15(%arg0: i32) -> (i32, i32, i32) {
    %c0_i32 = arith.constant 0 : i32
    %c0_i32_0 = arith.constant 0 : i32
    %c0_i32_1 = arith.constant 0 : i32
    %c0_i32_2 = arith.constant 0 : i32
    return %c0_i32, %c0_i32_0, %c0_i32_1 : i32, i32, i32
  }
  func.func @transform_16(%arg0: i32) -> (i32, i32) {
    %c0_i32 = arith.constant 0 : i32
    %c0_i32_0 = arith.constant 0 : i32
    %c0_i32_1 = arith.constant 0 : i32
    return %c0_i32, %c0_i32_0 : i32, i32
  }
  func.func @transform_17(%arg0: i32) -> (i32, i32) {
    %c0_i32 = arith.constant 0 : i32
    %c0_i32_0 = arith.constant 0 : i32
    %c0_i32_1 = arith.constant 0 : i32
    return %c0_i32, %c0_i32_0 : i32, i32
  }
  func.func @transform_18(%arg0: i32) -> (i32, i32) {
    %c0_i32 = arith.constant 0 : i32
    %c0_i32_0 = arith.constant 0 : i32
    %c0_i32_1 = arith.constant 0 : i32
    return %c0_i32, %c0_i32_0 : i32, i32
  }
  func.func @transform_19(%arg0: i32) -> (i32, i32) {
    %c0_i32 = arith.constant 0 : i32
    %c0_i32_0 = arith.constant 0 : i32
    %c0_i32_1 = arith.constant 0 : i32
    return %c0_i32, %c0_i32_0 : i32, i32
  }
  func.func @transform_20(%arg0: i32) -> (i32, i32, i32) {
    %c0_i32 = arith.constant 0 : i32
    %c0_i32_0 = arith.constant 0 : i32
    %c0_i32_1 = arith.constant 0 : i32
    return %arg0, %c0_i32, %c0_i32_0 : i32, i32, i32
  }
  func.func @transform_21(%arg0: i32) -> (i32, i32, i32) {
    %c0_i32 = arith.constant 0 : i32
    %c0_i32_0 = arith.constant 0 : i32
    %c0_i32_1 = arith.constant 0 : i32
    return %arg0, %c0_i32, %c0_i32_0 : i32, i32, i32
  }
}

</mosaic_0001>

<bundles_post_ra>
// kernel: tpu_custom_call.1
= control target key start
LH: loop header
LB: loop body
LE: loop exit
PB: predicated region body
PF: predicated region fallthrough
CT: control target
= control target key end

     0   :  { %s3645_s0 = inlined_call_operand.hbm [shape: f32[2,8,32], index: 0, kind: input, shape index: {}]   ;;  %s3646_s1 = inlined_call_operand.vmem [shape: f32[2,1,8], index: 1, kind: input, shape index: {}]   ;;  %s3647_s2 = inlined_call_operand.hbm [shape: f32[1,32], index: 2, kind: input, shape index: {}]   ;;  %s3648_s3 = inlined_call_operand.hbm [shape: f32[1,32], index: 3, kind: input, shape index: {}]   ;;  %s3649_s4 = inlined_call_operand.vmem [shape: f32[2,32,96], index: 4, kind: input, shape index: {}]   ;;  %s3650_s5 = inlined_call_operand.vmem [shape: f32[2,1,96], index: 5, kind: input, shape index: {}]   ;;  %s3651_s6 = inlined_call_operand.vmem [shape: f32[2,32,32], index: 6, kind: input, shape index: {}]   ;;  %s3652_s7 = inlined_call_operand.vmem [shape: f32[2,1,32], index: 7, kind: input, shape index: {}]   ;;  %s3653_s8 = inlined_call_operand.hbm [shape: f32[2,1,32], index: 8, kind: input, shape index: {}]   ;;  %s3654_s9 = inlined_call_operand.vmem [shape: f32[2,1,32], index: 9, kind: input, shape index: {}]   ;;  %s3655_s10 = inlined_call_operand.vmem [shape: f32[2,32,64], index: 10, kind: input, shape index: {}]   ;;  %s3656_s11 = inlined_call_operand.hbm [shape: f32[2,1,64], index: 11, kind: input, shape index: {}]   ;;  %s3657_s12 = inlined_call_operand.vmem [shape: f32[2,64,32], index: 12, kind: input, shape index: {}]   ;;  %s3658_s13 = inlined_call_operand.vmem [shape: f32[2,1,32], index: 13, kind: input, shape index: {}]   ;;  %s3659_s14 = inlined_call_operand.hbm [shape: f32[2,1,32], index: 14, kind: input, shape index: {}]   ;;  %s3660_s15 = inlined_call_operand.vmem [shape: f32[2,1,32], index: 15, kind: input, shape index: {}]   ;;  %s3661_s16 = inlined_call_operand.vmem [shape: f32[32,32], index: 16, kind: input, shape index: {}]   ;;  %s3662_s17 = inlined_call_operand.hbm [shape: f32[1,32], index: 17, kind: input, shape index: {}]   ;;  %s3663_s18 = inlined_call_operand.vmem [shape: f32[32,3], index: 18, kind: input, shape index: {}]   ;;  %s3664_s19 = inlined_call_operand.vmem [shape: f32[1,3], index: 19, kind: input, shape index: {}]   ;;  %s3665_s20 = inlined_call_operand.vmem [shape: f32[2,1,3], index: 20, kind: input, shape index: {}]   ;;  %s3666_s21 = inlined_call_operand.hbm [shape: f32[2,8,128], index: 21, kind: output, shape index: {}]  }
   0x1   :  { %3679 = sst [smem:[#allocation21_spill]] %s3645_s0 }
   0x2   :  { %3680 = sst [smem:[#allocation22_spill]] %s3646_s1 }
   0x3   :  { %3681 = sst [smem:[#allocation23_spill]] %s3647_s2 }
   0x4   :  { %3682 = sst [smem:[#allocation24_spill]] %s3648_s3 }
   0x5   :  { %3683 = sst [smem:[#allocation25_spill]] %s3649_s4 }
   0x6   :  { %3684 = sst [smem:[#allocation26_spill]] %s3650_s5 }
   0x7   :  { %3685 = sst [smem:[#allocation27_spill]] %s3653_s8 }
   0x8   :  { %3686 = sst [smem:[#allocation28_spill]] %s3656_s11 }
   0x9   :  { %3687 = sst [smem:[#allocation29_spill]] %s3659_s14 }
   0xa   :  { %3688 = sst [smem:[#allocation30_spill]] %s3660_s15 }
   0xb   :  { %3689 = sst [smem:[#allocation31_spill]] %s3661_s16 }
   0xc   :  { %3690 = sst [smem:[#allocation32_spill]] %s3662_s17 }
   0xd   :  { %3691 = sst [smem:[#allocation33_spill]] %s3663_s18 }
   0xe   :  { %3692 = sst [smem:[#allocation34_spill]] %s3664_s19 }
   0xf   :  { %3693 = sst [smem:[#allocation35_spill]] %s3665_s20 }
  0x10   :  { %3694 = sst [smem:[#allocation36_spill]] %s3666_s21 }
  0x11   :  { %26 = vsyncpa [#allocation3], 0 }
  0x12   :  { %28 = vsyncpa [#allocation3 + $0x1], 0 }
  0x13   :  { %29 = vsyncpa [#allocation6], 0 }
  0x14   :  { %30 = vsyncpa [#allocation9], 0 }
  0x15   :  { %31 = vsyncpa [#allocation12], 0 }
  0x16   :  { %32 = vsyncpa [#allocation4], 0 }
  0x17   :  { %34 = vsyncpa [#allocation4 + $0x1], 0  ;;  %s3133_s2 = smov 0   ;;  %s3135_s25 = smov 0  }
  0x18   :  { %s3137_s26 = smov 0   ;;  %s3139_s27 = smov 0  }
  0x19 LB: > { %s3695_s29 = sld [smem:[#allocation23_spill]]  ;;  %s3157_s4 = sadd.s32 4294967295, %s3007_s27   ;;  %s3007_s27 = sphi %s3139_s27, %s3727_s27   ;;  %s3003_s26 = sphi %s3137_s26, %s3726_s26   ;;  %s2999_s25 = sphi %s3135_s25, %s3725_s25   ;;  %s2995_s2 = sphi %s3133_s2, %s3724_s2  }
  0x1a   : > { %p2441_p0 = scmp.ge.s32.totalorder %s3007_s27, 1  ;;  %p61_p1 = scmp.eq.s32.totalorder %s3157_s4, 0 }
  0x1b   : > { %p527_p2 = scmp.lt.s32.totalorder %s3007_s27, 3  ;;  %s3009_s5 = smov [#allocation5]  }
  0x1c   : > { %s541_s22 = sshll.u32 %s3009_s5, 4  ;;  %s3697_s8 = sld [smem:[#allocation27_spill]]  ;;  %s542_s22 = int_to_ptr.vmem [resolvable:$true] %s541_s22 }
  0x1d   : > { %p3162_p3 = pnand %p2441_p0, %p527_p2  ;;  %s3010_s28 = smov [#allocation8]  }
  0x1e   : > { %s3011_s5 = smov 16   ;;  %s3012_s21 = smov 1  }
  0x1f   : > { %s539_s0 = sshll.u32 %s3695_s29, 4  ;;  %p2543_p5 = pneg %p3162_p3  ;;  %s540_s0 = int_to_ptr.hbm [resolvable:$true] %s539_s0 }
  0x20   : > { %s576_s29 = sshll.u32 %s3010_s28, 4  ;;  %s3699_s14 = sld [smem:[#allocation29_spill]]  ;;  %s577_s29 = int_to_ptr.vmem [resolvable:$true] %s576_s29 }
  0x21   : > { %p3174_p6 = pnand %p2543_p5, %p61_p1  ;;  %s3013_s20 = smov [#allocation11]  }
  0x22   : > { %s574_s24 = sshll.u32 %s3697_s8, 4  ;;  %s616_s19 = sshll.u32 %s3013_s20, 4  ;;  %s575_s24 = int_to_ptr.hbm [resolvable:$true] %s574_s24  ;;  %s617_s19 = int_to_ptr.vmem [resolvable:$true] %s616_s19 }
  0x23   : > { %2546 = dma.hbm_to_vmem [thread:$0]  (!%p3174_p6), %s540_s0, 16, %s542_s22, [#allocation6]  }
  0x24   : > { %2552 = dma.hbm_to_vmem [thread:$0]  (!%p3174_p6), %s575_s24, 32, %s577_s29, [#allocation9], %s3011_s5, %s3011_s5, %s3012_s21  }
  0x25   : > { %s3700_s28 = sld [smem:[#allocation24_spill]]  ;;  %s3014_s0 = smov [#allocation7]  }
  0x26   : > { %s614_s8 = sshll.u32 %s3699_s14, 4  ;;  %s553_s22 = sshll.u32 %s3014_s0, 4  ;;  %s615_s8 = int_to_ptr.hbm [resolvable:$true] %s614_s8  ;;  %s554_s22 = int_to_ptr.vmem [resolvable:$true] %s553_s22 }
  0x27   : > { %2558 = dma.hbm_to_vmem [thread:$0]  (!%p3174_p6), %s615_s8, 32, %s617_s19, [#allocation12], %s3011_s5, %s3011_s5, %s3012_s21  }
  0x28   : > { %s3701_s11 = sld [smem:[#allocation28_spill]]  ;;  %s3015_s19 = smov [#allocation10]  }
  0x29   : > { %s3702_s17 = sld [smem:[#allocation32_spill]]  ;;  %s596_s20 = sshll.u32 %s3015_s19, 4  ;;  %s597_s20 = int_to_ptr.vmem [resolvable:$true] %s596_s20 }
  0x2a   : > { %s3016_s1 = smov [#allocation13]   ;;  %s3204_s0 = sadd.s32 1, %s3007_s27  }
  0x2b   : > { %s551_s15 = sshll.u32 %s3700_s28, 4  ;;  %s2440_s28 = sadd.s32 4294967294, %s3007_s27   ;;  %s552_s15 = int_to_ptr.hbm [resolvable:$true] %s551_s15 }
  0x2c   : > { %2549 = dma.hbm_to_vmem [thread:$0]  (!%p3174_p6), %s552_s15, 16, %s554_s22, [#allocation6]  }
  0x2d   : > { %s637_s15 = sshll.u32 %s3016_s1, 4  ;;  %s44_s22 = ssub.s32 %s3007_s27, %s3204_s0  ;;  %s638_s15 = int_to_ptr.vmem [resolvable:$true] %s637_s15 }
  0x2e   : > { %s594_s23 = sshll.u32 %s3701_s11, 4  ;;  %s47_s24 = sadd.s32 1, %s3003_s26  ;;  %s595_s23 = int_to_ptr.hbm [resolvable:$true] %s594_s23 }
  0x2f   : > { %s635_s8 = sshll.u32 %s3702_s17, 4  ;;  %p45_p7 = scmp.eq.s32.totalorder %s44_s22, 0  ;;  %s636_s8 = int_to_ptr.hbm [resolvable:$true] %s635_s8 }
  0x30   : > { %2555 = dma.hbm_to_vmem [thread:$0]  (!%p3174_p6), %s595_s23, 32, %s597_s20, [#allocation9], %s3011_s5, %s3011_s5, %s3012_s21  }
  0x31   : > { %2561 = dma.hbm_to_vmem [thread:$0]  (!%p3174_p6), %s636_s8, 16, %s638_s15, [#allocation12]  }
  0x32   : > { %p54_p8 = scmp.ne.s32.totalorder %s3003_s26, %s2999_s25  ;;  %p55_p9 = scmp.eq.s32.totalorder %s3007_s27, 0 }
  0x33   : > { %p60_p10 = scmp.ne.s32.totalorder %s2999_s25, %s2995_s2  ;;  %p514_p13 = scmp.eq.s32.totalorder %s3157_s4, 1 }
  0x34   : > { %s3215_s21 = scalar_select %p45_p7, %s3003_s26, %s47_s24  }
  0x35   : > { %p3217_p11 = por %p55_p9, %p54_p8  ;;  %p3223_p12 = por %p61_p1, %p60_p10 }
  0x36   : > { %3703 = sst [smem:[#allocation20_spill]] %s3215_s21  ;;  %p520_p0 = scmp.eq.s32.totalorder %s2440_s28, 1 }
  0x37   : > { %p2576_p2 = scmp.lt.s32.totalorder %s3007_s27, 2  ;;  %s654_s29 = sand.u32 1, %s3003_s26  }
  0x38   : > { %p3230_p5 = por %p514_p13, %p54_p8  ;;  %p3234_p6 = por %p520_p0, %p60_p10 }
  0x39   : > { %s2449_s18 = sshll.u32 %s654_s29, 3  ;;  %s2450_s8 = sshll.u32 %s3007_s27, 3 }
  0x3a   : > { %s3708_s1 = sld [smem:[#allocation21_spill]]  ;;  %s658_s22 = scalar_lea.vmem [#allocation2], %s2449_s18 }
  0x3b   : > { %s666_s24 = sshll.u32 %s658_s22, 4  ;;  %p3244_p7 = pnand %p2576_p2, %p3217_p11  ;;  %s667_s24 = int_to_ptr.vmem [resolvable:$true] %s666_s24 }
  0x3c   : > { %s655_s14 = scalar_lea.sflag [#allocation3], %s654_s29 }
  0x3d   : > { %p2903_p9 = pneg %p3244_p7 }
  0x40   : > { %s662_s15 = scalar_lea.hbm %s3708_s1, %s2450_s8  ;;  %s2906_s19 = scalar_lea.hbm %s3708_s1, 16 }
  0x41   : > { %s664_s11 = sshll.u32 %s662_s15, 4  ;;  %s665_s11 = int_to_ptr.hbm [resolvable:$true] %s664_s11 }
  0x42   : > { %s2899_s17 = sshra.s32 %s665_s11, 4  ;;  %s2900_s17 = int_to_ptr.hbm [resolvable:$true] %s2899_s17 }
  0x43   : > { %s2901_s21 = scalar_lea.hbm %s2900_s17, 8  ;;  %p2907_p11 = scmp.lt.s32.totalorder %s2900_s17, %s3708_s1 }
  0x44   : > { %p2902_p8 = scmp.ne.s32.totalorder %s2900_s17, %s2901_s21  ;;  %p2908_p0 = scmp.lt.s32.totalorder %s2906_s19, %s2901_s21 }
  0x46   : > { %p2904_p10 = pnand %p2903_p9, %p2902_p8  ;;  %p2909_p2 = por %p2908_p0, %p2907_p11 }
  0x48   : > { %p2905_p13 = pneg %p2904_p10 }
  0x4a   : > { %p2910_p4 = pnand %p2909_p2, %p2905_p13 }
  0x4c   : > { %2913 = shalt.err (!%p2910_p4)
}
  0x4d   : > { %2565 = dma.hbm_to_vmem [thread:$0]  (!%p3244_p7), %s665_s11, 128, %s667_s24, %s655_s14  }
  0x4e   : > { %687 = sbr.rel (%p3162_p3) target bundleno = 5269 (0x1495), region = 104  ;;  %s3261_s29 = sand.u32 (!%p3162_p3), 1, %s2999_s25  }
  0x4f   : > { %s3674_s15 = sshll.u32 (!%p3162_p3), %s3261_s29, 3  ;;  %s690_s22 = scalar_lea.sflag (!%p3162_p3), [#allocation3], %s3261_s29 }
  0x50   : > { %s693_s17 = scalar_lea.vmem (!%p3162_p3), [#allocation2], %s3674_s15 }
  0x53   : > { %2974 = dma.done.wait (%p3223_p12), %s690_s22, 128  }
  0x54   : > { %2976 = vsyncadd (%p3223_p12), %s690_s22, 4294967168 }
  0x55   : > { %2978 = dma.done.wait (%p61_p1), [#allocation6], 32  }
  0x56   : > { %2980 = vsyncadd (%p61_p1), [#allocation6], 4294967264 }
  0x57   : > { %2982 = dma.done.wait (%p61_p1), [#allocation9], 64  }
  0x58   : > { %2984 = vsyncadd (%p61_p1), [#allocation9], 4294967232 }
  0x59   : > { %2986 = dma.done.wait (%p61_p1), [#allocation12], 48  }
  0x5a   : > { %2988 = vsyncadd (%p61_p1), [#allocation12], 4294967248  ;;  %vm798_vm0 = vcmask 261120   ;;  %v795_v0 = vld [vmem:[%s693_s17] sm:$0xff]  ;;  %s3710_s30 = sld [smem:[#allocation25_spill]]  ;;  %s3017_s22 = smov 112  }
  0x5b   : > { %v799_v1 = vsel %vm798_vm0, %v795_v0, 0.0  ;;  %v802_v2 = vmul.f32 %v795_v0, %v795_v0  ;;  %v2665_v22 = vld [vmem:[#allocation5] ss:$0 sm:$0xff]  ;;  %v2666_v25 = vld [vmem:[#allocation7] ss:$0 sm:$0xff]  ;;  %s3711_s5 = sld [smem:[#allocation26_spill]] }
  0x5c   : > { %800 = vadd.xlane.f32.xlu0 %v799_v1  ;;  %s3018_s17 = smov 96   ;;  %vm941_vm4 = vcmask 130048   ;;  %p789_p1 = scmp.lt.s32.totalorder %s3157_s4, 1  ;;  %vm990_vm5 = vcmask 64512   ;;  %vm1238_vm14 = vcmask 1047556  }
  0x5d   : > { %v803_v3 = vsel %vm798_vm0, %v802_v2, 0.0  ;;  %s3712_s3 = sld [smem:[#allocation22_spill]]  ;;  %s3676_s28 = smov 64  }
  0x5e   : > { %s3310_s11 = scalar_select %p789_p1, %s3157_s4, 1 }
  0x5f   : > { %s3713_s15 = sld [smem:[#allocation30_spill]]  ;;  %s2512_s18 = sshll.u32 %s3157_s4, 3 }
  0x60   : > { %v840_v4 = vld [vmem:[%s3710_s30 + $0x18] sm:$0xff]  ;;  %v839_v5 = vld [vmem:[%s3710_s30 + $0x10] sm:$0xff]  ;;  %v838_v7 = vld [vmem:[%s3710_s30 + $0x8] sm:$0xff]  ;;  %s3716_s20 = sld [smem:[#allocation31_spill]]  ;;  %s2280_s4 = scalar_lea.sflag [#allocation4], %s3261_s29 }
  0x61   : > { %860 = vmatpush.msra.mxu0 %v840_v4  ;;  %v837_v8 = vld [vmem:[%s3710_s30] sm:$0xff]  ;;  %s3717_s14 = sld [smem:[#allocation33_spill]] }
  0x62   : > { %v2667_v28 = vld [vmem:[%s3711_s5] ss:$0 sm:$0xff]  ;;  %s3719_s21 = sld [smem:[#allocation35_spill]] }
  0x63   : > { %861 = vmatpush.msra.mxu0 %v839_v5  ;;  %s791_s24 = scalar_lea.vmem %s3712_s3, %s3310_s11  ;;  %s3675_s3 = smov 16  }
  0x64   : > { %804 = vadd.xlane.f32.xlu0 %v803_v3  ;;  %v831_v40 = vld [vmem:[%s791_s24] sm:$0x1] }
  0x65   : > { %862 = vmatpush.msra.mxu0 %v838_v7  ;;  %v832_v41 = vsub.f32 1.0, %v831_v40  ;;  %v1334_v40 = vld [vmem:[%s3651_s6 + $0x8] sm:$0xff] }
  0x67   : > { %863 = vmatpush.msra.mxu0 %v837_v8  ;;  %v833_v42 = vmul.f32 -1e+09, %v832_v41 }
  0x68   : > { %s794_s24 = scalar_lea.vmem %s3719_s21, %s3310_s11 }
  0x69   : > { %v3316_v43 = vperm.slane %v833_v42, 0 }
  0xcf   : > { %v801_v6 = vpop.xlane.xlu0 %800 }
  0xd0   : > { %v806_v9 = vmul.f32 0.03125, %v801_v6 }
  0xd2   : > { %v808_v11 = vmul.f32 %v806_v9, %v806_v9  ;;  %v821_v21 = vsub.f32 %v795_v0, %v806_v9 }
  0xd7   : > { %v805_v10 = vpop.xlane.xlu0 %804 }
  0xd8   : > { %v807_v12 = vmul.f32 0.03125, %v805_v10 }
  0xda   : > { %v809_v13 = vsub.f32 %v807_v12, %v808_v11 }
  0xdc   : > { %v810_v14 = vadd.f32 1e-12, %v809_v13 }
  0xde   : > { %2683 = vrsqrt.f32 %v810_v14  ;;  %vm817_vm2 = vweird.f32 %v810_v14 }
  0xe4   : > { %v2684_v15 = vpop.eup %2683 }
  0xe5   : > { %v812_v16 = vmul.f32 %v2684_v15, %v810_v14  ;;  %vm818_vm1 = vweird.f32 %v2684_v15 }
  0xe6   : > { %vm819_vm3 = vmor %vm817_vm2, %vm818_vm1 }
  0xe7   : > { %v813_v17 = vmul.f32 %v2684_v15, %v812_v16 }
  0xe9   : > { %v814_v18 = vmul.f32 0.5, %v813_v17 }
  0xeb   : > { %v815_v19 = vsub.f32 1.5, %v814_v18 }
  0xed   : > { %v816_v20 = vmul.f32 %v2684_v15, %v815_v19 }
  0xef   : > { %v820_v23 = vsel %vm819_vm3, %v2684_v15, %v816_v20  ;;  %vm1451_vm3 = vcmask 523264  }
  0xf0   : > { %v822_v24 = vmul.f32 %v821_v21, %v820_v23 }
  0xf2   : > { %v826_v26 = vmul.f32 %v2665_v22, %v822_v24 }
  0xf4   : > { %v3297_v27 = vadd.f32 %v2666_v25, %v826_v26 }
  0xf6   : > { %2460 = vmatmul.msk.f32.vlgmr.msra.gmra.mxu0 %vm798_vm0, %v3297_v27 }
 0x173   : > { %v865_v29 = vpop.f32.mrf.mxu0 }
 0x174   : > { %v866_v30 = vadd.f32 %v2667_v28, %v865_v29 }
 0x176   : > { %869 = vrot.lane.b32.xlu1 %v866_v30, %s3017_s22 }
 0x1e8   : > { %v870_v31 = vpop.permute.xlu1 %869 }
 0x1e9   : > { %v2631_v32 = vpack.i.bf16 %v870_v31, %v866_v30 }
 0x1eb   : > { %2632 = vrot.lane.b32.xlu1 %v2631_v32, %s3018_s17 }
 0x25d   : > { %v2633_v33 = vpop.permute.xlu1 %2632 }
 0x25e   : > { %2637 = vxpose.xlu2.b32.start.end [1/1] (short) (narrow) %v2633_v33, 16  ;;  %v3020_v33 = vmov 1983009808  }
 0x2f7   : > { %v2638_v34 = vpop.trf.xlu2 }
 0x2f8   : > { %v2639_v38 = vunpack.i.l.bf16 %v2638_v34  ;;  %v2642_v39 = vunpack.i.h.bf16 %v2638_v34  ;;  %v1241_v34 = vunpack.c.l.s4 %v3020_v33  ;;  %v2668_v33 = vld [vmem:[%s3652_s7] ss:$0 sm:$0xff] }
 0x2ff   : > { %v2643_v35 = vpop.trf.xlu2 }
 0x300   : > { %v2644_v36 = vunpack.i.l.bf16 %v2643_v35  ;;  %v2647_v37 = vunpack.i.h.bf16 %v2643_v35 }
 0x302   : > { %958 = vmatpush.msra.mxu1 %v2644_v36  ;;  %980 = vmatpush.msra.mxu2 %v2647_v37  ;;  %v3332_v36 = vunpack.c.0.s8 %v1241_v34 }
 0x304   : > { %959 = vmatpush.msra.mxu1 %v2639_v38  ;;  %981 = vmatpush.msra.mxu2 %v2642_v39  ;;  %v1336_v38 = vld [vmem:[%s3651_s6 + $0x18] sm:$0xff]  ;;  %v1335_v39 = vld [vmem:[%s3651_s6 + $0x10] sm:$0xff] }
 0x305   : > { %2461 = vmatmul.msk.f32.vlgmr.msra.gmra.mxu1 %vm941_vm4, %v866_v30  ;;  %2462 = vmatmul.msk.f32.vlgmr.msra.gmra.mxu2 %vm941_vm4, %v870_v31 }
 0x306   : > { %1356 = vmatpush.msrb.mxu2 %v1336_v38 }
 0x308   : > { %1357 = vmatpush.msrb.mxu2 %v1335_v39 }
 0x30a   : > { %1358 = vmatpush.msrb.mxu2 %v1334_v40 }
 0x382   : > { %v961_v44 = vpop.f32.mrf.mxu1 }
 0x383   : > { %v986_v45 = vmul.f32 0.25, %v961_v44  ;;  %v3021_v44 = vmov 1934713408  }
 0x385   : > { %v988_v46 = vadd.f32 %v986_v45, %v3316_v43  ;;  %v1263_v45 = vunpack.c.l.s4 %v3021_v44  ;;  %v1399_v44 = vld [vmem:[%s3655_s10] sm:$0xff] }
 0x387   : > { %v991_v47 = vsel %vm990_vm5, %v988_v46, -inf }
 0x388   : > { %v983_v48 = vpop.f32.mrf.mxu2  ;;  %992 = vmax.xlane.f32.xlu2 %v991_v47 }
 0x389   : > { %v987_v49 = vmul.f32 0.25, %v983_v48  ;;  %v3346_v48 = vunpack.c.0.s8 %v1263_v45 }
 0x38b   : > { %v989_v50 = vadd.f32 %v987_v49, %v3316_v43 }
 0x38d   : > { %v994_v51 = vsel %vm990_vm5, %v989_v50, -inf }
 0x38e   : > { %995 = vmax.xlane.f32.xlu0 %v994_v51 }
 0x3a2   : > { %1039 = vrot.lane.b32.xlu0 %v866_v30, %s3676_s28 }
 0x3fb   : > { %v993_v52 = vpop.xlane.xlu2 %992 }
 0x3fc   : > { %v997_v53 = vsub.f32 %v988_v46, %v993_v52 }
 0x3fe   : > { %v999_v54 = vmul.f32 1.442695, %v997_v53 }
 0x400   : > { %2685 = vpow2.f32 %v999_v54 }
 0x401   : > { %v996_v55 = vpop.xlane.xlu0 %995 }
 0x402   : > { %v998_v56 = vsub.f32 %v989_v50, %v996_v55 }
 0x404   : > { %v1001_v57 = vmul.f32 1.442695, %v998_v56 }
 0x406   : > { %v2686_v58 = vpop.eup %2685  ;;  %2687 = vpow2.f32 %v1001_v57 }
 0x407   : > { %v1003_v59 = vsel %vm990_vm5, %v2686_v58, 0.0 }
 0x408   : > { %1004 = vadd.xlane.f32.xlu1 %v1003_v59 }
 0x40c   : > { %v2688_v60 = vpop.eup %2687 }
 0x40d   : > { %v1006_v61 = vsel %vm990_vm5, %v2688_v60, 0.0 }
 0x40e   : > { %1007 = vadd.xlane.f32.xlu0 %v1006_v61 }
 0x414   : > { %v1040_v62 = vpop.permute.xlu0 %1039 }
 0x421   : > { %1041 = vrot.lane.b32.xlu1 %v870_v31, %s3676_s28  ;;  %s3715_s28 = smov 16  }
 0x456   : > { %1045 = vxpose.xlu1.b32.start.end [1/1] (short) (narrow) %v1040_v62, 16 }
 0x47b   : > { %v1005_v63 = vpop.xlane.xlu1 %1004 }
 0x47c   : > { %2689 = vrcp.f32 %v1005_v63  ;;  %v1020_v4 = vand.u32 2147483648, %v1005_v63  ;;  %v1018_v6 = vand.u32 2147483647, %v1005_v63  ;;  %vm1014_vm7 = vweird.f32 %v1005_v63 }
 0x47e   : > { %v1021_v10 = vor.u32 1.1754944e-38, %v1020_v4  ;;  %vm1019_vm9 = vcmp.eq.f32.partialorder %v1018_v6, 8.507059e+37 }
 0x481   : > { %v1008_v0 = vpop.xlane.xlu0 %1007 }
 0x482   : > { %v2690_v1 = vpop.eup %2689  ;;  %2691 = vrcp.f32 %v1008_v0  ;;  %v1035_v13 = vand.u32 2147483648, %v1008_v0  ;;  %v1033_v17 = vand.u32 2147483647, %v1008_v0  ;;  %vm1029_vm11 = vweird.f32 %v1008_v0 }
 0x483   : > { %v1010_v2 = vmul.f32 %v2690_v1, %v1005_v63  ;;  %vm1015_vm6 = vweird.f32 %v2690_v1 }
 0x484   : > { %vm1016_vm8 = vmor %vm1014_vm7, %vm1015_vm6  ;;  %v1036_v19 = vor.u32 1.1754944e-38, %v1035_v13  ;;  %vm1034_vm13 = vcmp.eq.f32.partialorder %v1033_v17, 8.507059e+37 }
 0x485   : > { %v1011_v3 = vsub.f32 1.0, %v1010_v2 }
 0x487   : > { %v1012_v5 = vmul.f32 %v2690_v1, %v1011_v3 }
 0x488   : > { %v2692_v7 = vpop.eup %2691 }
 0x489   : > { %v1025_v8 = vmul.f32 %v2692_v7, %v1008_v0  ;;  %v1013_v9 = vadd.f32 %v2690_v1, %v1012_v5  ;;  %vm1030_vm10 = vweird.f32 %v2692_v7 }
 0x48a   : > { %vm1031_vm12 = vmor %vm1029_vm11, %vm1030_vm10 }
 0x48b   : > { %v1026_v11 = vsub.f32 1.0, %v1025_v8  ;;  %v1017_v12 = vsel %vm1016_vm8, %v2690_v1, %v1013_v9 }
 0x48c   : > { %v1022_v14 = vsel %vm1019_vm9, %v1021_v10, %v1017_v12 }
 0x48d   : > { %v1027_v15 = vmul.f32 %v2692_v7, %v1026_v11  ;;  %v1023_v16 = vmul.f32 %v2686_v58, %v1022_v14 }
 0x48f   : > { %2463 = vmatpush.xpose.msk.msra.mxu3 %vm990_vm5, %v1023_v16  ;;  %v1028_v18 = vadd.f32 %v2692_v7, %v1027_v15 }
 0x491   : > { %v1032_v20 = vsel %vm1031_vm12, %v2692_v7, %v1028_v18 }
 0x492   : > { %v1037_v21 = vsel %vm1034_vm13, %v1036_v19, %v1032_v20 }
 0x493   : > { %v1042_v22 = vpop.permute.xlu1 %1041  ;;  %v1038_v23 = vmul.f32 %v2688_v60, %v1037_v21 }
 0x494   : > { %1077 = vxpose.xlu0.b32.start.end [1/1] (short) (narrow) %v1042_v22, 16 }
 0x495   : > { %2466 = vmatpush.xpose.msk.msrb.mxu1 %vm990_vm5, %v1038_v23 }
 0x4fa   : > { %v1061_v24 = vpop.trf.xlu1 }
 0x4fb   : > { %2464 = vmatmul.msk.f32.vlgmr.msra.gmra.mxu3 %vm990_vm5, %v1061_v24 }
 0x502   : > { %v1062_v25 = vpop.trf.xlu1 }
 0x503   : > { %2465 = vmatmul.msk.f32.gmra.mxu3 %vm990_vm5, %v1062_v25 }
 0x538   : > { %v1093_v26 = vpop.trf.xlu0 }
 0x539   : > { %2467 = vmatmul.msk.f32.vlgmr.msrb.gmra.mxu1 %vm990_vm5, %v1093_v26 }
 0x540   : > { %v1094_v28 = vpop.trf.xlu0 }
 0x541   : > { %2468 = vmatmul.msk.f32.gmra.mxu1 %vm990_vm5, %v1094_v28 }
 0x57e   : > { %v1135_v29 = vpop.f32.mrf.mxu3 }
 0x57f   : > { %1173 = vxpose.xlu0.b32.start [1/2] (short) (narrow) %v1135_v29, 8 }
 0x586   : > { %v1138_v30 = vpop.f32.mrf.mxu3 }
 0x587   : > { %1174 = vxpose.xlu0.b32.end [2/2] (short) (narrow) %v1138_v30, 8  ;;  %v1333_v30 = vld [vmem:[%s3651_s6] sm:$0xff] }
 0x588   : > { %1359 = vmatpush.msrb.mxu2 %v1333_v30  ;;  %v2475_v30 = vld [vmem:[%s3710_s30 + $0x38] sm:$0xff] }
 0x58a   : > { %1535 = vmatpush.msra.mxu2 %v2475_v30 }
 0x5b6   : > { %v1167_v31 = vpop.f32.mrf.mxu1 }
 0x5b7   : > { %1205 = vxpose.xlu2.b32.start [1/2] (short) (narrow) %v1167_v31, 8 }
 0x5be   : > { %v1170_v32 = vpop.f32.mrf.mxu1 }
 0x5bf   : > { %1206 = vxpose.xlu2.b32.end [2/2] (short) (narrow) %v1170_v32, 8 }
 0x623   : > { %v1189_v35 = vpop.trf.xlu0 }
 0x624   : > { %v1237_v37 = vrot.slane %v1189_v35, 4  ;;  %v1243_v42 = vperm.slane %v1189_v35, %v3332_v36 }
 0x626   : > { %v1239_v41 = vsel %vm1238_vm14, 0.0, %v1237_v37  ;;  %v1260_v47 = vrot.slane %v1243_v42, 4 }
 0x627   : > { %v1247_v46 = vperm.slane %v1239_v41, %v3332_v36  ;;  %v1402_v41 = vld [vmem:[%s3655_s10 + $0x18] sm:$0xff] }
 0x628   : > { %1422 = vmatpush.msrb.mxu0 %v1402_v41 }
 0x629   : > { %v1272_v52 = vrot.slane %v1247_v46, 4 }
 0x650   : > { %v1221_v49 = vpop.trf.xlu2 }
 0x651   : > { %v1248_v50 = vrot.slane %v1221_v49, 4  ;;  %v1253_v51 = vperm.slane %v1221_v49, %v3332_v36 }
 0x653   : > { %v1249_v53 = vsel %vm1238_vm14, 0.0, %v1248_v50  ;;  %v1258_v54 = vrot.slane %v1253_v51, 4  ;;  %v1261_v55 = vsel %vm1238_vm14, %v1253_v51, %v1260_v47 }
 0x654   : > { %v1257_v56 = vperm.slane %v1249_v53, %v3332_v36  ;;  %v1269_v57 = vperm.slane %v1261_v55, %v3346_v48 }
 0x655   : > { %v1259_v58 = vsel %vm1238_vm14, %v1258_v54, %v1243_v42  ;;  %v1401_v42 = vld [vmem:[%s3655_s10 + $0x10] sm:$0xff] }
 0x656   : > { %v1265_v59 = vperm.slane %v1259_v58, %v3346_v48  ;;  %v1270_v60 = vrot.slane %v1257_v56, 4  ;;  %v1273_v61 = vsel %vm1238_vm14, %v1257_v56, %v1272_v52  ;;  %v1284_v62 = vrot.slane %v1269_v57, 4  ;;  %1423 = vmatpush.msrb.mxu0 %v1401_v42 }
 0x657   : > { %v1281_v63 = vperm.slane %v1273_v61, %v3346_v48 }
 0x658   : > { %v1271_v0 = vsel %vm1238_vm14, %v1270_v60, %v1247_v46  ;;  %v1282_v1 = vrot.slane %v1265_v59, 4  ;;  %v1285_v2 = vsel %vm1238_vm14, 0.0, %v1284_v62  ;;  %v1290_v9 = vsel %vm1238_vm14, %v1284_v62, %v1265_v59  ;;  %v2669_v60 = vld [vmem:[#allocation8] ss:$0 sm:$0xff] }
 0x659   : > { %v1277_v3 = vperm.slane %v1271_v0, %v3346_v48  ;;  %v1288_v4 = vrot.slane %v1281_v63, 4  ;;  %v1295_v5 = vrot.slane %v1285_v2, 4  ;;  %v1294_v14 = vperm.slane %v1290_v9, %v3332_v36  ;;  %v2670_v63 = vld [vmem:[%s3654_s9] ss:$0 sm:$0xff]  ;;  %v1446_v2 = vld [vmem:[%s3657_s12 + $0x38] sm:$0xff] }
 0x65a   : > { %v1283_v6 = vsel %vm1238_vm14, 0.0, %v1282_v1  ;;  %1463 = vmatpush.msrb.mxu3 %v1446_v2  ;;  %v1439_v9 = vld [vmem:[%s3657_s12] sm:$0xff] }
 0x65b   : > { %v1286_v7 = vrot.slane %v1277_v3, 4  ;;  %v1289_v8 = vsel %vm1238_vm14, 0.0, %v1288_v4  ;;  %v1296_v10 = vsel %vm1238_vm14, %v1295_v5, %v1283_v6  ;;  %v1301_v15 = vsel %vm1238_vm14, %v1288_v4, %v1277_v3  ;;  %v1445_v3 = vld [vmem:[%s3657_s12 + $0x30] sm:$0xff]  ;;  %v1444_v4 = vld [vmem:[%s3657_s12 + $0x28] sm:$0xff]  ;;  %v1443_v5 = vld [vmem:[%s3657_s12 + $0x20] sm:$0xff] }
 0x65c   : > { %v1306_v11 = vrot.slane %v1289_v8, 4  ;;  %v1300_v12 = vperm.slane %v1296_v10, %v3332_v36  ;;  %v1305_v20 = vperm.slane %v1301_v15, %v3332_v36  ;;  %1464 = vmatpush.msrb.mxu3 %v1445_v3  ;;  %v1442_v6 = vld [vmem:[%s3657_s12 + $0x18] sm:$0xff]  ;;  %v1440_v8 = vld [vmem:[%s3657_s12 + $0x8] sm:$0xff]  ;;  %v2671_v10 = vld [vmem:[#allocation10] ss:$0 sm:$0xff] }
 0x65d   : > { %v1287_v13 = vsel %vm1238_vm14, 0.0, %v1286_v7  ;;  %v1441_v7 = vld [vmem:[%s3657_s12 + $0x10] sm:$0xff] }
 0x65e   : > { %v1307_v16 = vsel %vm1238_vm14, %v1306_v11, %v1287_v13  ;;  %v1312_v17 = vrot.slane %v1300_v12, 4  ;;  %1465 = vmatpush.msrb.mxu3 %v1444_v4 }
 0x65f   : > { %v1311_v18 = vperm.slane %v1307_v16, %v3332_v36 }
 0x660   : > { %v1313_v19 = vsel %vm1238_vm14, %v1312_v17, %v1294_v14  ;;  %1466 = vmatpush.msrb.mxu3 %v1443_v5 }
 0x661   : > { %v1317_v21 = vperm.slane %v1313_v19, %v3346_v48  ;;  %v1318_v22 = vrot.slane %v1311_v18, 4 }
 0x662   : > { %1467 = vmatpush.msrb.mxu3 %v1442_v6 }
 0x663   : > { %v1319_v23 = vsel %vm1238_vm14, %v1318_v22, %v1305_v20  ;;  %v1326_v24 = vrot.slane %v1317_v21, 4  ;;  %v2672_v22 = vld [vmem:[%s3658_s13] ss:$0 sm:$0xff] }
 0x664   : > { %v1323_v25 = vperm.slane %v1319_v23, %v3346_v48  ;;  %1468 = vmatpush.msrb.mxu3 %v1441_v7 }
 0x666   : > { %v1327_v26 = vsel %vm1238_vm14, %v1323_v25, %v1326_v24  ;;  %v1324_v28 = vrot.slane %v1323_v25, 4  ;;  %1469 = vmatpush.msrb.mxu3 %v1440_v8 }
 0x667   : > { %1329 = vrot.lane.b32.xlu1 %v1327_v26, %s3675_s3  ;;  %s3718_s3 = sld [smem:[#allocation34_spill]] }
 0x668   : > { %v1325_v29 = vsel %vm1238_vm14, %v1324_v28, %v1317_v21  ;;  %1470 = vmatpush.msrb.mxu3 %v1439_v9 }
 0x6d9   : > { %v1330_v31 = vpop.permute.xlu1 %1329 }
 0x6da   : > { %v1332_v32 = vsel %vm941_vm4, %v1325_v29, %v1330_v31  ;;  %v2474_v31 = vld [vmem:[%s3710_s30 + $0x30] sm:$0xff] }
 0x6db   : > { %2469 = vmatmul.msk.f32.vlgmr.msrb.gmra.mxu2 %vm798_vm0, %v1332_v32  ;;  %v2473_v32 = vld [vmem:[%s3710_s30 + $0x28] sm:$0xff] }
 0x6dc   : > { %1536 = vmatpush.msra.mxu2 %v2474_v31 }
 0x6de   : > { %1537 = vmatpush.msra.mxu2 %v2473_v32 }
 0x75e   : > { %v1361_v34 = vpop.f32.mrf.mxu2 }
 0x75f   : > { %v1362_v35 = vadd.f32 %v2668_v33, %v1361_v34  ;;  %v2472_v33 = vld [vmem:[%s3710_s30 + $0x20] sm:$0xff] }
 0x760   : > { %1538 = vmatpush.msra.mxu2 %v2472_v33 }
 0x761   : > { %v1364_v37 = vadd.f32 %v1362_v35, %v3297_v27  ;;  %v1400_v27 = vld [vmem:[%s3655_s10 + $0x8] sm:$0xff] }
 0x762   : > { %1424 = vmatpush.msrb.mxu0 %v1400_v27 }
 0x763   : > { %v1367_v38 = vsel %vm798_vm0, %v1364_v37, 0.0  ;;  %v1370_v39 = vmul.f32 %v1364_v37, %v1364_v37 }
 0x764   : > { %1368 = vadd.xlane.f32.xlu0 %v1367_v38  ;;  %1425 = vmatpush.msrb.mxu0 %v1399_v44 }
 0x765   : > { %v1371_v40 = vsel %vm798_vm0, %v1370_v39, 0.0 }
 0x766   : > { %1372 = vadd.xlane.f32.xlu2 %v1371_v40 }
 0x7d7   : > { %v1369_v45 = vpop.xlane.xlu0 %1368 }
 0x7d8   : > { %v1374_v46 = vmul.f32 0.03125, %v1369_v45 }
 0x7d9   : > { %v1373_v47 = vpop.xlane.xlu2 %1372 }
 0x7da   : > { %v1376_v49 = vmul.f32 %v1374_v46, %v1374_v46  ;;  %v1375_v50 = vmul.f32 0.03125, %v1373_v47  ;;  %v1389_v59 = vsub.f32 %v1364_v37, %v1374_v46 }
 0x7dc   : > { %v1377_v51 = vsub.f32 %v1375_v50, %v1376_v49  ;;  %v2673_v50 = vld [vmem:[#allocation11] ss:$0 sm:$0xff] }
 0x7de   : > { %v1378_v52 = vadd.f32 1e-12, %v1377_v51 }
 0x7e0   : > { %2693 = vrsqrt.f32 %v1378_v52  ;;  %vm1385_vm1 = vweird.f32 %v1378_v52 }
 0x7e6   : > { %v2694_v53 = vpop.eup %2693 }
 0x7e7   : > { %v1380_v54 = vmul.f32 %v2694_v53, %v1378_v52  ;;  %vm1386_vm15 = vweird.f32 %v2694_v53 }
 0x7e8   : > { %vm1387_vm2 = vmor %vm1385_vm1, %vm1386_vm15 }
 0x7e9   : > { %v1381_v55 = vmul.f32 %v2694_v53, %v1380_v54 }
 0x7eb   : > { %v1382_v56 = vmul.f32 0.5, %v1381_v55 }
 0x7ed   : > { %v1383_v57 = vsub.f32 1.5, %v1382_v56  ;;  %v2675_v56 = vld [vmem:[%s3711_s5 + $0x1] ss:$0 sm:$0xff] }
 0x7ef   : > { %v1384_v58 = vmul.f32 %v2694_v53, %v1383_v57 }
 0x7f1   : > { %v1388_v61 = vsel %vm1387_vm2, %v2694_v53, %v1384_v58  ;;  %v2674_v53 = vld [vmem:[%s3713_s15] ss:$0 sm:$0xff] }
 0x7f2   : > { %v1390_v62 = vmul.f32 %v1389_v59, %v1388_v61 }
 0x7f4   : > { %v1394_v0 = vmul.f32 %v2669_v60, %v1390_v62 }
 0x7f6   : > { %v1398_v1 = vadd.f32 %v2670_v63, %v1394_v0 }
 0x7f8   : > { %2470 = vmatmul.msk.f32.vlgmr.msrb.gmra.mxu0 %vm798_vm0, %v1398_v1 }
 0x875   : > { %v1427_v11 = vpop.f32.mrf.mxu0 }
 0x876   : > { %v1428_v12 = vadd.f32 %v2671_v10, %v1427_v11 }
 0x878   : > { %v1430_v13 = vmul.f32 %v1428_v12, %v1428_v12 }
 0x87a   : > { %v1431_v14 = vmul.f32 %v1430_v13, %v1428_v12 }
 0x87c   : > { %v1432_v15 = vmul.f32 0.044715, %v1431_v14 }
 0x87e   : > { %v1433_v16 = vadd.f32 %v1432_v15, %v1428_v12 }
 0x880   : > { %v1434_v17 = vmul.f32 0.7978846, %v1433_v16 }
 0x882   : > { %2695 = vtanh.f32 %v1434_v17 }
 0x888   : > { %v2696_v18 = vpop.eup %2695 }
 0x889   : > { %v1436_v19 = vadd.f32 1.0, %v2696_v18 }
 0x88b   : > { %v1437_v20 = vmul.f32 0.5, %v1436_v19 }
 0x88d   : > { %v1438_v21 = vmul.f32 %v1437_v20, %v1428_v12 }
 0x88f   : > { %2471 = vmatmul.msk.f32.vlgmr.msrb.gmra.mxu3 %vm1451_vm3, %v1438_v21 }
 0x912   : > { %v1472_v23 = vpop.f32.mrf.mxu3 }
 0x913   : > { %v1473_v24 = vadd.f32 %v2672_v22, %v1472_v23 }
 0x915   : > { %v1475_v25 = vadd.f32 %v1473_v24, %v1398_v1 }
 0x917   : > { %v1478_v26 = vsel %vm798_vm0, %v1475_v25, 0.0  ;;  %v1481_v28 = vmul.f32 %v1475_v25, %v1475_v25 }
 0x918   : > { %1479 = vadd.xlane.f32.xlu1 %v1478_v26 }
 0x919   : > { %v1482_v29 = vsel %vm798_vm0, %v1481_v28, 0.0 }
 0x91a   : > { %1483 = vadd.xlane.f32.xlu0 %v1482_v29 }
 0x98b   : > { %v1480_v34 = vpop.xlane.xlu1 %1479 }
 0x98c   : > { %v1485_v35 = vmul.f32 0.03125, %v1480_v34 }
 0x98d   : > { %v1484_v37 = vpop.xlane.xlu0 %1483 }
 0x98e   : > { %v1487_v38 = vmul.f32 %v1485_v35, %v1485_v35  ;;  %v1486_v39 = vmul.f32 0.03125, %v1484_v37  ;;  %v1500_v49 = vsub.f32 %v1475_v25, %v1485_v35 }
 0x990   : > { %v1488_v40 = vsub.f32 %v1486_v39, %v1487_v38 }
 0x992   : > { %v1489_v41 = vadd.f32 1e-12, %v1488_v40 }
 0x994   : > { %2697 = vrsqrt.f32 %v1489_v41  ;;  %vm1496_vm7 = vweird.f32 %v1489_v41 }
 0x99a   : > { %v2698_v42 = vpop.eup %2697 }
 0x99b   : > { %v1491_v27 = vmul.f32 %v2698_v42, %v1489_v41  ;;  %vm1497_vm6 = vweird.f32 %v2698_v42 }
 0x99c   : > { %vm1498_vm8 = vmor %vm1496_vm7, %vm1497_vm6 }
 0x99d   : > { %v1492_v44 = vmul.f32 %v2698_v42, %v1491_v27 }
 0x99f   : > { %v1493_v45 = vmul.f32 0.5, %v1492_v44 }
 0x9a1   : > { %v1494_v46 = vsub.f32 1.5, %v1493_v45 }
 0x9a3   : > { %v1495_v47 = vmul.f32 %v2698_v42, %v1494_v46 }
 0x9a5   : > { %v1499_v51 = vsel %vm1498_vm8, %v2698_v42, %v1495_v47  ;;  %vm2248_vm8 = vcmask 16384  }
 0x9a6   : > { %v1501_v52 = vmul.f32 %v1500_v49, %v1499_v51 }
 0x9a8   : > { %v1505_v54 = vmul.f32 %v2673_v50, %v1501_v52 }
 0x9aa   : > { %v3450_v55 = vadd.f32 %v2674_v53, %v1505_v54 }
 0x9ac   : > { %2477 = vmatmul.msk.f32.vlgmr.msra.gmra.mxu2 %vm798_vm0, %v3450_v55 }
 0xa2f   : > { %v1540_v57 = vpop.f32.mrf.mxu2 }
 0xa30   : > { %v1541_v58 = vadd.f32 %v2675_v56, %v1540_v57 }
 0xa32   : > { %1544 = vrot.lane.b32.xlu0 %v1541_v58, %s3017_s22  ;;  %s3714_s22 = smov 64  }
 0xaa4   : > { %v1545_v59 = vpop.permute.xlu0 %1544 }
 0xaa5   : > { %v2648_v60 = vpack.i.bf16 %v1545_v59, %v1541_v58 }
 0xaa7   : > { %2649 = vrot.lane.b32.xlu1 %v2648_v60, %s3018_s17  ;;  %v2489_v60 = vld [vmem:[%s3651_s6 + $0x38] sm:$0xff] }
 0xb19   : > { %v2650_v61 = vpop.permute.xlu1 %2649 }
 0xb1a   : > { %2654 = vxpose.xlu2.b32.start.end [1/1] (short) (narrow) %v2650_v61, 16  ;;  %v2488_v61 = vld [vmem:[%s3651_s6 + $0x30] sm:$0xff] }
 0xbb3   : > { %v2655_v62 = vpop.trf.xlu2 }
 0xbb4   : > { %v2656_v2 = vunpack.i.l.bf16 %v2655_v62  ;;  %v2659_v3 = vunpack.i.h.bf16 %v2655_v62 }
 0xbbb   : > { %v2660_v63 = vpop.trf.xlu2 }
 0xbbc   : > { %v2664_v0 = vunpack.i.h.bf16 %v2660_v63  ;;  %v2661_v1 = vunpack.i.l.bf16 %v2660_v63  ;;  %v2487_v63 = vld [vmem:[%s3651_s6 + $0x28] sm:$0xff] }
 0xbbe   : > { %1632 = vmatpush.msra.mxu0 %v2661_v1  ;;  %1654 = vmatpush.msra.mxu1 %v2664_v0 }
 0xbc0   : > { %1633 = vmatpush.msra.mxu0 %v2656_v2  ;;  %1655 = vmatpush.msra.mxu1 %v2659_v3 }
 0xbc1   : > { %2478 = vmatmul.msk.f32.vlgmr.msra.gmra.mxu0 %vm941_vm4, %v1541_v58  ;;  %2479 = vmatmul.msk.f32.vlgmr.msra.gmra.mxu1 %vm941_vm4, %v1545_v59 }
 0xbc2   : > { %2030 = vmatpush.msrb.mxu0 %v2489_v60  ;;  %v2495_v60 = vld [vmem:[%s3655_s10 + $0x30] sm:$0xff] }
 0xbc4   : > { %2031 = vmatpush.msrb.mxu0 %v2488_v61  ;;  %v2493_v61 = vld [vmem:[%s3655_s10 + $0x20] sm:$0xff] }
 0xbc6   : > { %2032 = vmatpush.msrb.mxu0 %v2487_v63 }
 0xc3e   : > { %v1635_v4 = vpop.f32.mrf.mxu0  ;;  %v1657_v5 = vpop.f32.mrf.mxu1 }
 0xc3f   : > { %v1660_v6 = vmul.f32 0.25, %v1635_v4  ;;  %v1661_v7 = vmul.f32 0.25, %v1657_v5 }
 0xc41   : > { %v1663_v8 = vadd.f32 %v1661_v7, %v3316_v43  ;;  %v1662_v9 = vadd.f32 %v1660_v6, %v3316_v43 }
 0xc43   : > { %v1667_v10 = vsel %vm990_vm5, %v1663_v8, -inf  ;;  %v1664_v11 = vsel %vm990_vm5, %v1662_v9, -inf }
 0xc44   : > { %1668 = vmax.xlane.f32.xlu1 %v1667_v10  ;;  %1665 = vmax.xlane.f32.xlu0 %v1664_v11 }
 0xc5d   : > { %1714 = vrot.lane.b32.xlu1 %v1545_v59, %s3714_s22 }
 0xcb7   : > { %v1669_v12 = vpop.xlane.xlu1 %1668  ;;  %v1666_v13 = vpop.xlane.xlu0 %1665 }
 0xcb8   : > { %v1671_v14 = vsub.f32 %v1663_v8, %v1669_v12  ;;  %v1670_v15 = vsub.f32 %v1662_v9, %v1666_v13 }
 0xcba   : > { %v1674_v16 = vmul.f32 1.442695, %v1671_v14  ;;  %v1672_v17 = vmul.f32 1.442695, %v1670_v15 }
 0xcbc   : > { %2699 = vpow2.f32 %v1674_v16 }
 0xcbd   : > { %2701 = vpow2.f32 %v1672_v17 }
 0xcc2   : > { %v2700_v18 = vpop.eup %2699 }
 0xcc3   : > { %v2702_v19 = vpop.eup %2701  ;;  %v1679_v43 = vsel %vm990_vm5, %v2700_v18, 0.0 }
 0xcc4   : > { %1680 = vadd.xlane.f32.xlu0 %v1679_v43  ;;  %v1676_v20 = vsel %vm990_vm5, %v2702_v19, 0.0 }
 0xcc5   : > { %1677 = vadd.xlane.f32.xlu2 %v1676_v20 }
 0xccf   : > { %v1715_v21 = vpop.permute.xlu1 %1714 }
 0xcd0   : > { %1750 = vxpose.xlu1.b32.start.end [1/1] (short) (narrow) %v1715_v21, 16 }
 0xcd8   : > { %1712 = vrot.lane.b32.xlu0 %v1541_v58, %s3714_s22 }
 0xd37   : > { %v1681_v22 = vpop.xlane.xlu0 %1680 }
 0xd38   : > { %v1678_v23 = vpop.xlane.xlu2 %1677  ;;  %2703 = vrcp.f32 %v1681_v22  ;;  %v1708_v31 = vand.u32 2147483648, %v1681_v22  ;;  %v1706_v34 = vand.u32 2147483647, %v1681_v22  ;;  %vm1702_vm11 = vweird.f32 %v1681_v22 }
 0xd39   : > { %2705 = vrcp.f32 %v1678_v23  ;;  %v1693_v32 = vand.u32 2147483648, %v1678_v23  ;;  %v1691_v37 = vand.u32 2147483647, %v1678_v23  ;;  %vm1687_vm12 = vweird.f32 %v1678_v23 }
 0xd3a   : > { %v1709_v40 = vor.u32 1.1754944e-38, %v1708_v31  ;;  %vm1707_vm1 = vcmp.eq.f32.partialorder %v1706_v34, 8.507059e+37 }
 0xd3b   : > { %v1694_v41 = vor.u32 1.1754944e-38, %v1693_v32  ;;  %vm1692_vm2 = vcmp.eq.f32.partialorder %v1691_v37, 8.507059e+37 }
 0xd3e   : > { %v2704_v24 = vpop.eup %2703 }
 0xd3f   : > { %v2706_v25 = vpop.eup %2705  ;;  %v1698_v26 = vmul.f32 %v2704_v24, %v1681_v22  ;;  %vm1703_vm9 = vweird.f32 %v2704_v24 }
 0xd40   : > { %v1683_v28 = vmul.f32 %v2706_v25, %v1678_v23  ;;  %vm1688_vm10 = vweird.f32 %v2706_v25  ;;  %vm1704_vm13 = vmor %vm1702_vm11, %vm1703_vm9  ;;  %vm2267_vm9 = vcmask 23552   ;;  %vm2276_vm11 = vcmask 1041408  }
 0xd41   : > { %v1699_v29 = vsub.f32 1.0, %v1698_v26  ;;  %vm1689_vm15 = vmor %vm1687_vm12, %vm1688_vm10  ;;  %vm2274_vm10 = vcmask 1040384  }
 0xd42   : > { %v1684_v30 = vsub.f32 1.0, %v1683_v28 }
 0xd43   : > { %v1700_v33 = vmul.f32 %v2704_v24, %v1699_v29 }
 0xd44   : > { %v1685_v35 = vmul.f32 %v2706_v25, %v1684_v30 }
 0xd45   : > { %v1701_v38 = vadd.f32 %v2704_v24, %v1700_v33 }
 0xd46   : > { %v1686_v39 = vadd.f32 %v2706_v25, %v1685_v35 }
 0xd47   : > { %v1705_v42 = vsel %vm1704_vm13, %v2704_v24, %v1701_v38 }
 0xd48   : > { %v1690_v27 = vsel %vm1689_vm15, %v2706_v25, %v1686_v39  ;;  %v1710_v44 = vsel %vm1707_vm1, %v1709_v40, %v1705_v42 }
 0xd49   : > { %v1695_v45 = vsel %vm1692_vm2, %v1694_v41, %v1690_v27  ;;  %v1711_v46 = vmul.f32 %v2700_v18, %v1710_v44 }
 0xd4a   : > { %v1713_v47 = vpop.permute.xlu0 %1712  ;;  %v1696_v49 = vmul.f32 %v2702_v19, %v1695_v45 }
 0xd4b   : > { %2483 = vmatpush.xpose.msk.msra.mxu3 %vm990_vm5, %v1711_v46  ;;  %1718 = vxpose.xlu0.b32.start.end [1/1] (short) (narrow) %v1713_v47, 16 }
 0xd4c   : > { %2480 = vmatpush.xpose.msk.msrb.mxu2 %vm990_vm5, %v1696_v49 }
 0xd74   : > { %v1766_v50 = vpop.trf.xlu1 }
 0xd75   : > { %2484 = vmatmul.msk.f32.vlgmr.msra.gmra.mxu3 %vm990_vm5, %v1766_v50  ;;  %v2486_v50 = vld [vmem:[%s3651_s6 + $0x20] sm:$0xff] }
 0xd76   : > { %2033 = vmatpush.msrb.mxu0 %v2486_v50  ;;  %v2192_v50 = vld [vmem:[%s3716_s20 + $0x8] sm:$0xff] }
 0xd7c   : > { %v1767_v51 = vpop.trf.xlu1 }
 0xd7d   : > { %2485 = vmatmul.msk.f32.gmra.mxu3 %vm990_vm5, %v1767_v51 }
 0xdef   : > { %v1734_v52 = vpop.trf.xlu0 }
 0xdf0   : > { %2481 = vmatmul.msk.f32.vlgmr.msrb.gmra.mxu2 %vm990_vm5, %v1734_v52 }
 0xdf7   : > { %v1735_v53 = vpop.trf.xlu0 }
 0xdf8   : > { %2482 = vmatmul.msk.f32.gmra.mxu2 %vm990_vm5, %v1735_v53  ;;  %v1840_v57 = vpop.f32.mrf.mxu3 }
 0xe00   : > { %v1843_v58 = vpop.f32.mrf.mxu3 }
 0xe73   : > { %v1808_v54 = vpop.f32.mrf.mxu2 }
 0xe74   : > { %1846 = vxpose.xlu0.b32.start [1/2] (short) (narrow) %v1808_v54, 8 }
 0xe7b   : > { %v1811_v56 = vpop.f32.mrf.mxu2 }
 0xe7c   : > { %1847 = vxpose.xlu0.b32.end [2/2] (short) (narrow) %v1811_v56, 8 }
 0xe84   : > { %1878 = vxpose.xlu0.b32.start [1/2] (short) (narrow) %v1840_v57, 8 }
 0xe8c   : > { %1879 = vxpose.xlu0.b32.end [2/2] (short) (narrow) %v1843_v58, 8 }
 0xf18   : > { %v1862_v59 = vpop.trf.xlu0 }
 0xf19   : > { %v1910_v62 = vrot.slane %v1862_v59, 4  ;;  %v1915_v1 = vperm.slane %v1862_v59, %v3332_v36  ;;  %v2496_v59 = vld [vmem:[%s3655_s10 + $0x38] sm:$0xff] }
 0xf1a   : > { %2100 = vmatpush.msrb.mxu1 %v2496_v59 }
 0xf1b   : > { %v1911_v0 = vsel %vm1238_vm14, 0.0, %v1910_v62  ;;  %v1932_v4 = vrot.slane %v1915_v1, 4 }
 0xf1c   : > { %v1919_v2 = vperm.slane %v1911_v0, %v3332_v36  ;;  %2101 = vmatpush.msrb.mxu1 %v2495_v60 }
 0xf1e   : > { %v1944_v10 = vrot.slane %v1919_v2, 4 }
 0xf28   : > { %v1894_v3 = vpop.trf.xlu0 }
 0xf29   : > { %v1920_v5 = vrot.slane %v1894_v3, 4  ;;  %v1925_v6 = vperm.slane %v1894_v3, %v3332_v36 }
 0xf2b   : > { %v1921_v7 = vsel %vm1238_vm14, 0.0, %v1920_v5  ;;  %v1930_v8 = vrot.slane %v1925_v6, 4  ;;  %v1933_v9 = vsel %vm1238_vm14, %v1925_v6, %v1932_v4 }
 0xf2c   : > { %v1929_v11 = vperm.slane %v1921_v7, %v3332_v36  ;;  %v1941_v12 = vperm.slane %v1933_v9, %v3346_v48 }
 0xf2d   : > { %v1931_v13 = vsel %vm1238_vm14, %v1930_v8, %v1915_v1 }
 0xf2e   : > { %v1937_v14 = vperm.slane %v1931_v13, %v3346_v48  ;;  %v1942_v15 = vrot.slane %v1929_v11, 4  ;;  %v1945_v16 = vsel %vm1238_vm14, %v1929_v11, %v1944_v10  ;;  %v1956_v17 = vrot.slane %v1941_v12, 4  ;;  %v2677_v12 = vld [vmem:[#allocation8 + $0x1] ss:$0 sm:$0xff] }
 0xf2f   : > { %v1953_v18 = vperm.slane %v1945_v16, %v3346_v48 }
 0xf30   : > { %v1943_v19 = vsel %vm1238_vm14, %v1942_v15, %v1919_v2  ;;  %v1954_v43 = vrot.slane %v1937_v14, 4  ;;  %v1957_v20 = vsel %vm1238_vm14, 0.0, %v1956_v17  ;;  %v1962_v28 = vsel %vm1238_vm14, %v1956_v17, %v1937_v14  ;;  %v2678_v15 = vld [vmem:[%s3654_s9 + $0x1] ss:$0 sm:$0xff] }
 0xf31   : > { %v1949_v21 = vperm.slane %v1943_v19, %v3346_v48  ;;  %v1960_v22 = vrot.slane %v1953_v18, 4  ;;  %v1967_v23 = vrot.slane %v1957_v20, 4  ;;  %v1966_v33 = vperm.slane %v1962_v28, %v3332_v36  ;;  %v2505_v18 = vld [vmem:[%s3657_s12 + $0x78] sm:$0xff]  ;;  %v2504_v19 = vld [vmem:[%s3657_s12 + $0x70] sm:$0xff]  ;;  %v2502_v20 = vld [vmem:[%s3657_s12 + $0x60] sm:$0xff] }
 0xf32   : > { %v1955_v24 = vsel %vm1238_vm14, 0.0, %v1954_v43  ;;  %2142 = vmatpush.msra.mxu2 %v2505_v18  ;;  %v2503_v43 = vld [vmem:[%s3657_s12 + $0x68] sm:$0xff] }
 0xf33   : > { %v1958_v25 = vrot.slane %v1949_v21, 4  ;;  %v1961_v26 = vsel %vm1238_vm14, 0.0, %v1960_v22  ;;  %v1968_v29 = vsel %vm1238_vm14, %v1967_v23, %v1955_v24  ;;  %v1973_v34 = vsel %vm1238_vm14, %v1960_v22, %v1949_v21  ;;  %v2501_v21 = vld [vmem:[%s3657_s12 + $0x58] sm:$0xff]  ;;  %v2500_v22 = vld [vmem:[%s3657_s12 + $0x50] sm:$0xff]  ;;  %v2499_v23 = vld [vmem:[%s3657_s12 + $0x48] sm:$0xff] }
 0xf34   : > { %v1978_v30 = vrot.slane %v1961_v26, 4  ;;  %v1972_v31 = vperm.slane %v1968_v29, %v3332_v36  ;;  %v1977_v40 = vperm.slane %v1973_v34, %v3332_v36  ;;  %2143 = vmatpush.msra.mxu2 %v2504_v19  ;;  %v2498_v24 = vld [vmem:[%s3657_s12 + $0x40] sm:$0xff] }
 0xf35   : > { %v1959_v32 = vsel %vm1238_vm14, 0.0, %v1958_v25  ;;  %v2679_v25 = vld [vmem:[#allocation10 + $0x1] ss:$0 sm:$0xff] }
 0xf36   : > { %v1979_v35 = vsel %vm1238_vm14, %v1978_v30, %v1959_v32  ;;  %v1984_v37 = vrot.slane %v1972_v31, 4  ;;  %2144 = vmatpush.msra.mxu2 %v2503_v43 }
 0xf37   : > { %v1983_v38 = vperm.slane %v1979_v35, %v3332_v36 }
 0xf38   : > { %v1985_v39 = vsel %vm1238_vm14, %v1984_v37, %v1966_v33  ;;  %2145 = vmatpush.msra.mxu2 %v2502_v20 }
 0xf39   : > { %v1989_v41 = vperm.slane %v1985_v39, %v3346_v48  ;;  %v1990_v42 = vrot.slane %v1983_v38, 4  ;;  %v2680_v39 = vld [vmem:[%s3658_s13 + $0x1] ss:$0 sm:$0xff] }
 0xf3a   : > { %2146 = vmatpush.msra.mxu2 %v2501_v21  ;;  %v2261_v21 = vld [vmem:[%s794_s24] sm:$0x1] }
 0xf3b   : > { %v1991_v27 = vsel %vm1238_vm14, %v1990_v42, %v1977_v40  ;;  %v1998_v44 = vrot.slane %v1989_v41, 4 }
 0xf3c   : > { %v1995_v45 = vperm.slane %v1991_v27, %v3346_v48  ;;  %v2676_v48 = vld [vmem:[%s3652_s7 + $0x1] ss:$0 sm:$0xff]  ;;  %2147 = vmatpush.msra.mxu2 %v2500_v22 }
 0xf3e   : > { %v1999_v46 = vsel %vm1238_vm14, %v1995_v45, %v1998_v44  ;;  %v1996_v47 = vrot.slane %v1995_v45, 4  ;;  %2148 = vmatpush.msra.mxu2 %v2499_v23 }
 0xf3f   : > { %2001 = vrot.lane.b32.xlu1 %v1999_v46, %s3715_s28  ;;  %s3720_s28 = sld [smem:[#allocation36_spill]] }
 0xf40   : > { %v1997_v49 = vsel %vm1238_vm14, %v1996_v47, %v1989_v41  ;;  %2149 = vmatpush.msra.mxu2 %v2498_v24  ;;  %v2194_v47 = vld [vmem:[%s3716_s20 + $0x18] sm:$0xff] }
 0xf41   : > { %2211 = vmatpush.msra.mxu0 %v2194_v47 }
 0xf45   : > { %s2290_s11 = scalar_lea.hbm %s3720_s28, %s2512_s18 }
 0xf46   : > { %s2294_s21 = sshll.u32 %s2290_s11, 4  ;;  %s2949_s11 = scalar_lea.hbm %s3720_s28, 16  ;;  %s2295_s21 = int_to_ptr.hbm [resolvable:$true] %s2294_s21 }
 0xf47   : > { %s2943_s24 = sshra.s32 %s2295_s21, 4  ;;  %s2944_s24 = int_to_ptr.hbm [resolvable:$true] %s2943_s24 }
 0xf48   : > { %s2945_s18 = scalar_lea.hbm %s2944_s24, 8  ;;  %p2950_p7 = scmp.lt.s32.totalorder %s2944_s24, %s3720_s28 }
 0xf49   : > { %p2946_p3 = scmp.ne.s32.totalorder %s2944_s24, %s2945_s18  ;;  %p2951_p8 = scmp.lt.s32.totalorder %s2949_s11, %s2945_s18 }
 0xf4b   : > { %p2947_p4 = pnand %p2946_p3, %p3230_p5  ;;  %p2952_p9 = por %p2951_p8, %p2950_p7 }
 0xf4d   : > { %p2948_p12 = pneg %p2947_p4 }
 0xf4f   : > { %p2953_p10 = pnand %p2952_p9, %p2948_p12 }
 0xfb1   : > { %v2002_v36 = vpop.permute.xlu1 %2001 }
 0xfb2   : > { %v2004_v51 = vsel %vm941_vm4, %v1997_v49, %v2002_v36  ;;  %v2193_v49 = vld [vmem:[%s3716_s20 + $0x10] sm:$0xff]  ;;  %v2191_v36 = vld [vmem:[%s3716_s20] sm:$0xff] }
 0xfb3   : > { %2491 = vmatmul.msk.f32.vlgmr.msrb.gmra.mxu0 %vm798_vm0, %v2004_v51 }
 0xfb4   : > { %2212 = vmatpush.msra.mxu0 %v2193_v49 }
 0xfb6   : > { %2213 = vmatpush.msra.mxu0 %v2192_v50 }
 0xfb8   : > { %2214 = vmatpush.msra.mxu0 %v2191_v36 }
0x1030   : > { %v2035_v52 = vpop.f32.mrf.mxu0 }
0x1031   : > { %v2036_v53 = vadd.f32 %v2676_v48, %v2035_v52 }
0x1033   : > { %v2038_v54 = vadd.f32 %v2036_v53, %v3450_v55  ;;  %v2494_v55 = vld [vmem:[%s3655_s10 + $0x28] sm:$0xff] }
0x1034   : > { %2102 = vmatpush.msrb.mxu1 %v2494_v55 }
0x1035   : > { %v2043_v56 = vsel %vm798_vm0, %v2038_v54, 0.0  ;;  %v2046_v57 = vmul.f32 %v2038_v54, %v2038_v54 }
0x1036   : > { %2044 = vadd.xlane.f32.xlu0 %v2043_v56  ;;  %2103 = vmatpush.msrb.mxu1 %v2493_v61 }
0x1037   : > { %v2047_v58 = vsel %vm798_vm0, %v2046_v57, 0.0 }
0x1038   : > { %2048 = vadd.xlane.f32.xlu2 %v2047_v58 }
0x10a9   : > { %v2045_v62 = vpop.xlane.xlu0 %2044 }
0x10aa   : > { %v2050_v63 = vmul.f32 0.03125, %v2045_v62 }
0x10ab   : > { %v2049_v0 = vpop.xlane.xlu2 %2048 }
0x10ac   : > { %v2052_v1 = vmul.f32 %v2050_v63, %v2050_v63  ;;  %v2051_v2 = vmul.f32 0.03125, %v2049_v0  ;;  %v2065_v11 = vsub.f32 %v2038_v54, %v2050_v63  ;;  %v2681_v63 = vld [vmem:[#allocation11 + $0x1] ss:$0 sm:$0xff] }
0x10ae   : > { %v2053_v3 = vsub.f32 %v2051_v2, %v2052_v1  ;;  %v2682_v2 = vld [vmem:[%s3713_s15 + $0x1] ss:$0 sm:$0xff] }
0x10b0   : > { %v2054_v4 = vadd.f32 1e-12, %v2053_v3 }
0x10b2   : > { %2707 = vrsqrt.f32 %v2054_v4  ;;  %vm2061_vm5 = vweird.f32 %v2054_v4 }
0x10b8   : > { %v2708_v5 = vpop.eup %2707 }
0x10b9   : > { %v2056_v6 = vmul.f32 %v2708_v5, %v2054_v4  ;;  %vm2062_vm4 = vweird.f32 %v2708_v5 }
0x10ba   : > { %vm2063_vm14 = vmor %vm2061_vm5, %vm2062_vm4 }
0x10bb   : > { %v2057_v7 = vmul.f32 %v2708_v5, %v2056_v6  ;;  %v2222_v6 = vld [vmem:[%s3717_s14 + $0x10] sm:$0xff] }
0x10bd   : > { %v2058_v8 = vmul.f32 0.5, %v2057_v7  ;;  %v2221_v7 = vld [vmem:[%s3717_s14 + $0x8] sm:$0xff] }
0x10bf   : > { %v2059_v9 = vsub.f32 1.5, %v2058_v8  ;;  %v2220_v8 = vld [vmem:[%s3717_s14] sm:$0xff] }
0x10c1   : > { %v2060_v10 = vmul.f32 %v2708_v5, %v2059_v9  ;;  %v2195_v9 = vld [vmem:[#allocation13] sm:$0x1] }
0x10c3   : > { %v2064_v13 = vsel %vm2063_vm14, %v2708_v5, %v2060_v10  ;;  %v2223_v5 = vld [vmem:[%s3717_s14 + $0x18] sm:$0xff] }
0x10c4   : > { %v2066_v14 = vmul.f32 %v2065_v11, %v2064_v13  ;;  %2240 = vmatpush.msra.mxu1 %v2223_v5  ;;  %v2224_v13 = vld [vmem:[%s3718_s3] sm:$0x1]  ;;  %s3721_s3 = sshll.u32 %s3261_s29, 3 }
0x10c5   : > { %s788_s22 = scalar_lea.vmem [#allocation14], %s3721_s3 }
0x10c6   : > { %v2070_v16 = vmul.f32 %v2677_v12, %v2066_v14  ;;  %2241 = vmatpush.msra.mxu1 %v2222_v6  ;;  %s2292_s17 = sshll.u32 %s788_s22, 4  ;;  %s2293_s17 = int_to_ptr.vmem [resolvable:$true] %s2292_s17 }
0x10c8   : > { %v2074_v17 = vadd.f32 %v2678_v15, %v2070_v16  ;;  %2242 = vmatpush.msra.mxu1 %v2221_v7 }
0x10ca   : > { %2497 = vmatmul.msk.f32.vlgmr.msrb.gmra.mxu1 %vm798_vm0, %v2074_v17 }
0x10cb   : > { %2243 = vmatpush.msra.mxu1 %v2220_v8 }
0x1147   : > { %v2105_v26 = vpop.f32.mrf.mxu1 }
0x1148   : > { %v2106_v28 = vadd.f32 %v2679_v25, %v2105_v26 }
0x114a   : > { %v2108_v29 = vmul.f32 %v2106_v28, %v2106_v28 }
0x114c   : > { %v2109_v30 = vmul.f32 %v2108_v29, %v2106_v28 }
0x114e   : > { %v2110_v31 = vmul.f32 0.044715, %v2109_v30 }
0x1150   : > { %v2111_v32 = vadd.f32 %v2110_v31, %v2106_v28 }
0x1152   : > { %v2112_v33 = vmul.f32 0.7978846, %v2111_v32 }
0x1154   : > { %2709 = vtanh.f32 %v2112_v33 }
0x115a   : > { %v2710_v34 = vpop.eup %2709 }
0x115b   : > { %v2114_v35 = vadd.f32 1.0, %v2710_v34 }
0x115d   : > { %v2115_v37 = vmul.f32 0.5, %v2114_v35 }
0x115f   : > { %v2116_v38 = vmul.f32 %v2115_v37, %v2106_v28 }
0x1161   : > { %2507 = vmatmul.msk.f32.vlgmr.msra.gmra.mxu2 %vm1451_vm3, %v2116_v38 }
0x11e4   : > { %v2151_v40 = vpop.f32.mrf.mxu2 }
0x11e5   : > { %v2152_v41 = vadd.f32 %v2680_v39, %v2151_v40 }
0x11e7   : > { %v2154_v42 = vadd.f32 %v2152_v41, %v2074_v17 }
0x11e9   : > { %v2159_v27 = vsel %vm798_vm0, %v2154_v42, 0.0  ;;  %v2162_v44 = vmul.f32 %v2154_v42, %v2154_v42 }
0x11ea   : > { %2160 = vadd.xlane.f32.xlu2 %v2159_v27 }
0x11eb   : > { %v2163_v45 = vsel %vm798_vm0, %v2162_v44, 0.0 }
0x11f2   : > { %2164 = vadd.xlane.f32.xlu2 %v2163_v45 }
0x125d   : > { %v2161_v46 = vpop.xlane.xlu2 %2160 }
0x125e   : > { %v2166_v51 = vmul.f32 0.03125, %v2161_v46 }
0x1260   : > { %v2168_v52 = vmul.f32 %v2166_v51, %v2166_v51  ;;  %v2181_v62 = vsub.f32 %v2154_v42, %v2166_v51 }
0x1265   : > { %v2165_v48 = vpop.xlane.xlu2 %2164 }
0x1266   : > { %v2167_v53 = vmul.f32 0.03125, %v2165_v48 }
0x1268   : > { %v2169_v54 = vsub.f32 %v2167_v53, %v2168_v52 }
0x126a   : > { %v2170_v56 = vadd.f32 1e-12, %v2169_v54 }
0x126c   : > { %2711 = vrsqrt.f32 %v2170_v56  ;;  %vm2177_vm6 = vweird.f32 %v2170_v56 }
0x1272   : > { %v2712_v57 = vpop.eup %2711 }
0x1273   : > { %v2172_v58 = vmul.f32 %v2712_v57, %v2170_v56  ;;  %vm2178_vm3 = vweird.f32 %v2712_v57 }
0x1274   : > { %vm2179_vm7 = vmor %vm2177_vm6, %vm2178_vm3 }
0x1275   : > { %v2173_v59 = vmul.f32 %v2712_v57, %v2172_v58 }
0x1277   : > { %v2174_v60 = vmul.f32 0.5, %v2173_v59 }
0x1279   : > { %v2175_v55 = vsub.f32 1.5, %v2174_v60 }
0x127b   : > { %v2176_v61 = vmul.f32 %v2712_v57, %v2175_v55 }
0x127d   : > { %v2180_v0 = vsel %vm2179_vm7, %v2712_v57, %v2176_v61 }
0x127e   : > { %v2182_v1 = vmul.f32 %v2181_v62, %v2180_v0 }
0x1280   : > { %v2186_v3 = vmul.f32 %v2681_v63, %v2182_v1 }
0x1282   : > { %v2190_v4 = vadd.f32 %v2682_v2, %v2186_v3 }
0x1284   : > { %2509 = vmatmul.msk.f32.vlgmr.msra.gmra.mxu0 %vm798_vm0, %v2190_v4 }
0x1301   : > { %v2216_v10 = vpop.f32.mrf.mxu0 }
0x1302   : > { %v2217_v11 = vadd.f32 %v2216_v10, %v2195_v9 }
0x1304   : > { %2713 = vtanh.f32 %v2217_v11 }
0x130a   : > { %v2714_v12 = vpop.eup %2713 }
0x130b   : > { %2510 = vmatmul.msk.f32.vlgmr.msra.gmra.mxu1 %vm798_vm0, %v2714_v12  ;;  %vm2269_vm0 = vcmask 7168  }
0x1388   : > { %v2245_v14 = vpop.f32.mrf.mxu1 }
0x1389   : > { %v2246_v15 = vadd.f32 %v2245_v14, %v2224_v13 }
0x138b   : > { %v2249_v16 = vsel %vm2248_vm8, %v2246_v15, -inf  ;;  %v2262_v22 = vmul.f32 %v2261_v21, %v2246_v15  ;;  %v2268_v33 = vsel %vm2267_vm9, %v2246_v15, 0.0 }
0x138c   : > { %2250 = vmax.xlane.f32.xlu2 %v2249_v16 }
0x138d   : > { %v2263_v23 = vsel %vm2248_vm8, %v2262_v22, 0.0 }
0x13ff   : > { %v2251_v17 = vpop.xlane.xlu2 %2250 }
0x1400   : > { %v2252_v18 = vsub.f32 %v2246_v15, %v2251_v17 }
0x1402   : > { %v2253_v19 = vmul.f32 1.442695, %v2252_v18 }
0x1404   : > { %2715 = vpow2.f32 %v2253_v19 }
0x140a   : > { %v2716_v43 = vpop.eup %2715 }
0x140b   : > { %v2255_v20 = vsel %vm2248_vm8, %v2716_v43, 0.0 }
0x140c   : > { %2256 = vadd.xlane.f32.xlu2 %v2255_v20 }
0x1414   : > { %2264 = vadd.xlane.f32.xlu2 %v2263_v23 }
0x147f   : > { %v2257_v24 = vpop.xlane.xlu2 %2256 }
0x1480   : > { %2717 = vlog2.f32 %v2257_v24 }
0x1486   : > { %v2718_v25 = vpop.eup %2717 }
0x1487   : > { %v2259_v26 = vmul.f32 0.6931472, %v2718_v25  ;;  %v2265_v29 = vpop.xlane.xlu2 %2264 }
0x1489   : > { %v2260_v28 = vadd.f32 %v2259_v26, %v2251_v17 }
0x148b   : > { %v2266_v30 = vsub.f32 %v2260_v28, %v2265_v29 }
0x148d   : > { %v2270_v31 = vsel %vm2269_vm0, %v2266_v30, 0.0 }
0x148e   : > { %v2272_v32 = vrot.slane %v2270_v31, 7 }
0x1490   : > { %v2275_v34 = vsel %vm2274_vm10, %v2268_v33, %v2272_v32 }
0x1491   : > { %v2277_v35 = vsel %vm2276_vm11, %v2275_v34, 0.0 }
0x1492   : > { %2278 = vst [vmem:[%s788_s22] sm:$0xff] %v2277_v35 }
0x1493   : > { %2956 = shalt.err (!%p2953_p10)
}
0x1494   : > { %2541 = dma.vmem_to_hbm [thread:$0]  (%p3230_p5), %s2293_s17, 128, %s2295_s21, %s2280_s4  }
0x1495 PF: > { %s2306_s29 = sand.u32 1, %s2995_s2   ;;  %p3722_p13 = scmp.ge.s32.totalorder %s3007_s27, 2 }
0x1496   : > { %s2307_s22 = scalar_lea.sflag [#allocation4], %s2306_s29 }
0x1497   : > { %p2567_p11 = pnand %p3722_p13, %p3234_p6 }
0x1499   : > { %p2568_p0 = pneg %p2567_p11 }
0x149b   : > { %2990 = dma.done.wait (%p2568_p0), %s2307_s22, 128  }
0x149c   : > { %2992 = vsyncadd (%p2568_p0), %s2307_s22, 4294967168  ;;  %s3723_s1 = sld [smem:[#allocation20_spill]]  ;;  %p37_p2 = scmp.ge.s32.totalorder %s3204_s0, 4  }
0x149d   : > { %s3724_s2 = smov %s2999_s25  ;;  %s3725_s25 = smov %s3003_s26 }
0x149e   : > { %s3727_s27 = smov %s3204_s0  ;;  %39 = sbr.rel (!%p37_p2) target bundleno = 25 (0x19), region = 191 }
0x14a2   : > { %s3726_s26 = smov %s3723_s1 }
0x14a3   :  { %2313 = vsyncpa [#allocation3], 1 }
0x14a4   :  { %2315 = vsyncpa [#allocation3 + $0x1], 1 }
0x14a5   :  { %2316 = vsyncpa [#allocation6], 1 }
0x14a6   :  { %2317 = vsyncpa [#allocation9], 1 }
0x14a7   :  { %2318 = vsyncpa [#allocation12], 1 }
0x14a8   :  { %2319 = vsyncpa [#allocation4], 1 }
0x14a9   :  { %2321 = vsyncpa [#allocation4 + $0x1], 1 }

</bundles_post_ra>
